<compile_context>
chip_gen: v7x
topology: tpu7x:2x2x1
jax: 0.10.0
libtpu: 0.0.40
codegen_flags: <defaults>
</compile_context>

<pallas_src>
import functools
import math

import jax
import jax.numpy as jnp
from jax.experimental import pallas as pl
from jax.experimental.pallas import tpu as pltpu


def _vmem_limit_bytes():
    """Generation-aware scoped-VMEM limit: ~3/4 of physical, capped at 96 MiB
    (v5e/v6e: 128 MiB -> 96 MiB; v7x: 64 MiB -> 48 MiB)."""
    cap = 128 << 20
    try:
        info = pltpu.get_tpu_info()
        cap = int(getattr(info, "vmem_capacity_bytes", 0)) or cap
    except Exception:
        pass
    return int(max(32 << 20, min(cap * 3 // 4, 96 << 20)))


# --------------------------------------------------------------------------------------
# Kernel A: flash-style multi-head attention + fc_out + value residual + LayerNorm1
#   grid = (batch, kv_tiles, heads), semantics = (parallel, arbitrary, arbitrary)
# --------------------------------------------------------------------------------------
def _flash_attn_ln_kernel(q_ref, k_ref, v_ref, vres_ref,
                          wq_ref, wk_ref, wv_ref, wo_ref,
                          bo_ref, g_ref, b_ref,
                          o_ref,
                          qh_s, m_s, l_s, hacc_s, oacc_s,
                          *, eps):
    kv, h = pl.program_id(1), pl.program_id(2)
    nkv, nh = pl.num_programs(1), pl.num_programs(2)
    last_kv = kv == nkv - 1

    S = q_ref.shape[1]
    Hd = wq_ref.shape[2]

    # First kv tile of this head: reset the per-head online-softmax state and stash
    # this head's Q projection (reused for every kv tile of this batch element).
    @pl.when(kv == 0)
    def _():
        m_s[h] = jnp.full((S, 1), -jnp.inf, jnp.float32)
        l_s[h] = jnp.zeros((S, 1), jnp.float32)
        hacc_s[h] = jnp.zeros((S, Hd), jnp.float32)
        qh_s[h] = jnp.dot(q_ref[0].astype(jnp.bfloat16), wq_ref[0],
                          preferred_element_type=jnp.float32).astype(jnp.bfloat16)

    # First head of the last kv sweep: zero the fused concat+fc_out accumulator.
    @pl.when(jnp.logical_and(last_kv, h == 0))
    def _():
        oacc_s[...] = jnp.zeros_like(oacc_s)

    # ---- flash update for (head h, kv tile kv) ----
    kh = jnp.dot(k_ref[0].astype(jnp.bfloat16), wk_ref[0],
                 preferred_element_type=jnp.float32)                     # (tk, Hd)
    vh = jnp.dot(v_ref[0].astype(jnp.bfloat16), wv_ref[0],
                 preferred_element_type=jnp.float32)                     # (tk, Hd)

    # energy = qh @ kh^T without materializing a transpose (1/sqrt(D) folded into Wq).
    energy = jax.lax.dot_general(qh_s[h], kh.astype(jnp.bfloat16),
                                 (((1,), (1,)), ((), ())),
                                 preferred_element_type=jnp.float32)     # (S, tk)
    # TODO(synk): optional attention mask (mask == 0 -> -1e20) would be applied here.

    m_prev = m_s[h]
    m_new = jnp.maximum(m_prev, jnp.max(energy, axis=-1, keepdims=True))
    alpha = jnp.exp(m_prev - m_new)
    p = jnp.exp(energy - m_new)
    l_s[h] = alpha * l_s[h] + jnp.sum(p, axis=-1, keepdims=True)
    hacc_s[h] = alpha * hacc_s[h] + jnp.dot(p.astype(jnp.bfloat16),
                                            vh.astype(jnp.bfloat16),
                                            preferred_element_type=jnp.float32)
    m_s[h] = m_new

    # Head finished: normalize and fold head-concat + fc_out into the (S, D) accumulator.
    @pl.when(last_kv)
    def _():
        oh = hacc_s[h] * pl.reciprocal(l_s[h], approx=True)              # (S, Hd)
        oacc_s[...] += jnp.dot(oh.astype(jnp.bfloat16), wo_ref[0],
                               preferred_element_type=jnp.float32)       # (S, D)

    # All heads finished: fc_out bias + value residual + LayerNorm1 (f32 math).
    @pl.when(jnp.logical_and(last_kv, h == nh - 1))
    def _():
        x = oacc_s[...] + bo_ref[...] + vres_ref[0]
        mean = jnp.mean(x, axis=-1, keepdims=True)
        var = jnp.mean((x - mean) ** 2, axis=-1, keepdims=True)
        y = (x - mean) * jax.lax.rsqrt(var + eps)
        o_ref[0] = (y * g_ref[...] + b_ref[...]).astype(o_ref.dtype)


def _pick_kv_tile(S):
    if S <= 512:
        return S
    for t in (512, 256, 128, 64, 32, 16, 8):
        if S % t == 0:
            return t
    return S  # awkward S: fall back to a single (untiled) kv block


def _run_attention_ln(q, k, v, wq_h, wk_h, wv_h, wo_h, bo, ln_g, ln_b, heads,
                      *, eps, vmem_limit):
    B, S, D = q.shape
    Hd = D // heads
    tk = _pick_kv_tile(S)

    act_full = pl.BlockSpec((1, S, D), lambda b, kv, h: (b, 0, 0))
    kv_tile = pl.BlockSpec((1, tk, D), lambda b, kv, h: (b, kv, 0))
    w_in = pl.BlockSpec((1, D, Hd), lambda b, kv, h: (h, 0, 0))
    w_out = pl.BlockSpec((1, Hd, D), lambda b, kv, h: (h, 0, 0))
    vec = pl.BlockSpec((1, D), lambda b, kv, h: (0, 0))

    return pl.pallas_call(
        functools.partial(_flash_attn_ln_kernel, eps=eps),
        out_shape=jax.ShapeDtypeStruct((B, S, D), jnp.bfloat16),  # bf16 intermediate
        grid=(B, S // tk, heads),
        in_specs=[act_full, kv_tile, kv_tile, act_full,
                  w_in, w_in, w_in, w_out, vec, vec, vec],
        out_specs=act_full,
        scratch_shapes=[
            pltpu.VMEM((heads, S, Hd), jnp.bfloat16),   # per-head Q stash
            pltpu.VMEM((heads, S, 1), jnp.float32),     # running max (lane-padded)
            pltpu.VMEM((heads, S, 1), jnp.float32),     # running denom (lane-padded)
            pltpu.VMEM((heads, S, Hd), jnp.float32),    # per-head flash accumulator
            pltpu.VMEM((S, D), jnp.float32),            # fused concat + fc_out acc
        ],
        compiler_params=pltpu.CompilerParams(
            dimension_semantics=("parallel", "arbitrary", "arbitrary"),
            vmem_limit_bytes=vmem_limit),
    )(q, k, v, v, wq_h, wk_h, wv_h, wo_h, bo, ln_g, ln_b)


# --------------------------------------------------------------------------------------
# Kernel B: FFN (Linear -> ReLU -> Linear) + LayerNorm2, row-tiled over B*S, F-tiled
#   grid = (row_tiles, f_tiles), semantics = (parallel, arbitrary)
# --------------------------------------------------------------------------------------
def _ffn_ln_kernel(x_ref, w1_ref, b1_ref, w2_ref, b2_ref, g_ref, b_ref, o_ref,
                   acc_ref, *, eps):
    j = pl.program_id(1)

    @pl.when(j == 0)
    def _():
        acc_ref[...] = jnp.zeros_like(acc_ref)

    x = x_ref[...].astype(jnp.bfloat16)                                      # (tm, D)
    hid = jnp.dot(x, w1_ref[...], preferred_element_type=jnp.float32) + b1_ref[...]
    hid = jnp.maximum(hid, 0.0).astype(jnp.bfloat16)                         # (tm, tf)
    acc_ref[...] += jnp.dot(hid, w2_ref[...], preferred_element_type=jnp.float32)

    @pl.when(j == pl.num_programs(1) - 1)
    def _():
        ff = acc_ref[...] + b2_ref[...]
        mean = jnp.mean(ff, axis=-1, keepdims=True)
        var = jnp.mean((ff - mean) ** 2, axis=-1, keepdims=True)
        y = (ff - mean) * jax.lax.rsqrt(var + eps)
        o_ref[...] = (y * g_ref[...] + b_ref[...]).astype(o_ref.dtype)


def _pick_row_tile(M, F, vmem_limit):
    """Row tile: as large as the VMEM budget allows (per-grid-step overhead ~0.35us),
    padding awkward M instead of collapsing to tiny tiles."""
    cap = (vmem_limit // 4) // (4 * max(F, 128))      # (tm, tf<=F) f32 hidden tile
    cap = max(128, min(1024, (cap // 8) * 8))
    if M <= cap:
        Mp = -(-M // 8) * 8
        return Mp, Mp
    for t in (1024, 512, 256, 128):
        if t <= cap and M % t == 0:
            return t, M
    t = min(cap, 512)
    return t, -(-M // t) * t


def _pick_f_tile(D, F, vmem_limit):
    """Shrink the F tile when the double-buffered bf16 w1/w2 tiles would not leave
    room for activations / the f32 accumulator (matters on v7x's 64 MiB VMEM)."""
    budget = vmem_limit // 3

    def wbytes(tf):
        return 2 * (D * tf + tf * D) * 2              # 2 buffers x (w1+w2 tile) x bf16

    tf = F
    while tf > 512 and tf % 2 == 0 and (tf // 2) % 128 == 0 and wbytes(tf) > budget:
        tf //= 2
    return tf


def _run_ffn_ln(x, w1, b1, w2, b2, ln_g, ln_b, *, eps, vmem_limit):
    M, D = x.shape
    F = w1.shape[1]
    tm, Mp = _pick_row_tile(M, F, vmem_limit)
    tf = _pick_f_tile(D, F, vmem_limit)
    if Mp != M:
        x = jnp.pad(x, ((0, Mp - M), (0, 0)))

    out = pl.pallas_call(
        functools.partial(_ffn_ln_kernel, eps=eps),
        out_shape=jax.ShapeDtypeStruct((Mp, D), jnp.float32),
        grid=(Mp // tm, F // tf),
        in_specs=[
            pl.BlockSpec((tm, D), lambda i, j: (i, 0)),
            pl.BlockSpec((D, tf), lambda i, j: (0, j)),
            pl.BlockSpec((1, tf), lambda i, j: (0, j)),
            pl.BlockSpec((tf, D), lambda i, j: (j, 0)),
            pl.BlockSpec((1, D), lambda i, j: (0, 0)),
            pl.BlockSpec((1, D), lambda i, j: (0, 0)),
            pl.BlockSpec((1, D), lambda i, j: (0, 0)),
        ],
        out_specs=pl.BlockSpec((tm, D), lambda i, j: (i, 0)),
        scratch_shapes=[pltpu.VMEM((tm, D), jnp.float32)],
        compiler_params=pltpu.CompilerParams(
            dimension_semantics=("parallel", "arbitrary"),
            vmem_limit_bytes=vmem_limit),
    )(x, w1, b1, w2, b2, ln_g, ln_b)
    return out[:M] if Mp != M else out


# --------------------------------------------------------------------------------------
# Parameters
# --------------------------------------------------------------------------------------
def init_params(rng, D, H, expansion):
    Hd = D // H
    F = expansion * D
    keys = jax.random.split(rng, 6)
    s = 0.05
    return {
        "heads": H,
        "wq": s * jax.random.normal(keys[0], (Hd, Hd), jnp.float32),
        "wk": s * jax.random.normal(keys[1], (Hd, Hd), jnp.float32),
        "wv": s * jax.random.normal(keys[2], (Hd, Hd), jnp.float32),
        "wo": s * jax.random.normal(keys[3], (D, D), jnp.float32),
        "bo": jnp.zeros((D,), jnp.float32),
        "ln_g": jnp.ones((D,), jnp.float32),
        "ln_b": jnp.zeros((D,), jnp.float32),
        "w1": s * jax.random.normal(keys[4], (D, F), jnp.float32),
        "b1": 0.01 * jnp.ones((F,), jnp.float32),
        "w2": s * jax.random.normal(keys[5], (F, D), jnp.float32),
        "b2": 0.01 * jnp.ones((D,), jnp.float32),
    }


def prepare_params(params):
    """One-time host-side prep: per-head weight slices (1/sqrt(D) folded into Wq),
    bf16 weight casts for the MXU, 2-D biases / LN params, VMEM budget."""
    H = params["heads"]
    Hd = params["wq"].shape[0]
    D = H * Hd
    scale = 1.0 / math.sqrt(D)          # reference scales energy by 1/sqrt(embed_dim)
    eye = jnp.eye(H, dtype=jnp.float32)

    def per_head_cols(w):               # shared (Hd, Hd) weight -> (H, D, Hd) slices
        bd = jnp.kron(eye, w)           # block-diagonal (D, D)
        return bd.reshape(D, H, Hd).transpose(1, 0, 2)

    return {
        "heads": H,
        "vmem_limit": _vmem_limit_bytes(),
        "wq_h": (per_head_cols(params["wq"]) * scale).astype(jnp.bfloat16),
        "wk_h": per_head_cols(params["wk"]).astype(jnp.bfloat16),
        "wv_h": per_head_cols(params["wv"]).astype(jnp.bfloat16),
        "wo_h": params["wo"].reshape(H, Hd, D).astype(jnp.bfloat16),
        "bo": params["bo"].reshape(1, -1).astype(jnp.float32),
        "ln_g": params["ln_g"].reshape(1, -1).astype(jnp.float32),
        "ln_b": params["ln_b"].reshape(1, -1).astype(jnp.float32),
        "w1": params["w1"].astype(jnp.bfloat16),
        "b1": params["b1"].reshape(1, -1).astype(jnp.float32),
        "w2": params["w2"].astype(jnp.bfloat16),
        "b2": params["b2"].reshape(1, -1).astype(jnp.float32),
    }


# --------------------------------------------------------------------------------------
# TransformerBlock forward (dropout in eval mode = identity)
# --------------------------------------------------------------------------------------
def transformer_block_forward(prepared, key, query, value, eps=1e-5):
    """key/query/value: [B, S, D] float32.  Returns [B, S, D] float32."""
    B, S, D = query.shape
    H = prepared["heads"]
    vmem_limit = prepared["vmem_limit"]

    # Fused: per-head QKV projection + flash attention + head-concat + fc_out
    #        + value residual + LayerNorm1.  bf16 (B, S, D) intermediate.
    n1 = _run_attention_ln(
        query, key, value,
        prepared["wq_h"], prepared["wk_h"], prepared["wv_h"], prepared["wo_h"],
        prepared["bo"], prepared["ln_g"], prepared["ln_b"], H,
        eps=eps, vmem_limit=vmem_limit)

    # Fused: Linear1 + ReLU + Linear2 + LayerNorm2 (no residual, same LN params,
    # matching the reference forward).
    n2 = _run_ffn_ln(
        n1.reshape(B * S, D),
        prepared["w1"], prepared["b1"], prepared["w2"], prepared["b2"],
        prepared["ln_g"], prepared["ln_b"],
        eps=eps, vmem_limit=vmem_limit)

    return n2.reshape(B, S, D)


# --------------------------------------------------------------------------------------
# Pure-JAX f32 reference (for numerical verification)
# --------------------------------------------------------------------------------------
def reference_forward(params, key, query, value, eps=1e-5):
    H = params["heads"]
    B, S, D = query.shape
    Hd = D // H
    scale = 1.0 / math.sqrt(D)

    def split(x):
        return x.reshape(B, S, H, Hd)

    q = jnp.einsum("bshd,de->bshe", split(query), params["wq"])
    k = jnp.einsum("bshd,de->bshe", split(key), params["wk"])
    v = jnp.einsum("bshd,de->bshe", split(value), params["wv"])
    energy = jnp.einsum("bqhe,bkhe->bhqk", q, k) * scale
    attn = jax.nn.softmax(energy, axis=-1)
    out = jnp.einsum("bhqk,bkhe->bqhe", attn, v).reshape(B, S, D)
    out = out @ params["wo"] + params["bo"]

    def ln(x):
        mean = jnp.mean(x, axis=-1, keepdims=True)
        var = jnp.mean((x - mean) ** 2, axis=-1, keepdims=True)
        return (x - mean) * jax.lax.rsqrt(var + eps) * params["ln_g"] + params["ln_b"]

    n1 = ln(out + value)                               # residual is `value`, shared LN
    ff = jnp.maximum(n1 @ params["w1"] + params["b1"], 0.0) @ params["w2"] + params["b2"]
    return ln(ff)                                      # no residual before 2nd LN


# --------------------------------------------------------------------------------------
# Demo
# --------------------------------------------------------------------------------------
if __name__ == "__main__":
    # Small but lane-aligned demo shapes: D = 128 keeps the output stores lane-dense.
    B, S, D, H, EXP = 2, 16, 128, 4, 4
    root = jax.random.PRNGKey(0)
    k_p, k_k, k_q, k_v = jax.random.split(root, 4)

    params = init_params(k_p, D, H, EXP)
    prepared = prepare_params(params)

    key_in = jax.random.normal(k_k, (B, S, D), jnp.float32)
    query_in = jax.random.normal(k_q, (B, S, D), jnp.float32)
    value_in = jax.random.normal(k_v, (B, S, D), jnp.float32)

    out = transformer_block_forward(prepared, key_in, query_in, value_in)
    jax.block_until_ready(out)

    assert out.shape == (B, S, D) and out.dtype == jnp.float32
    assert bool(jnp.all(jnp.isfinite(out)))

    # Numerical check vs. the pure-JAX f32 reference (kernels use bf16 MXU inputs).
    ref = reference_forward(params, key_in, query_in, value_in)
    max_err = float(jnp.max(jnp.abs(out - ref)))
    assert max_err < 0.1, f"max abs error vs reference: {max_err}"

    print("KERNEL_OK")
</pallas_src>

<mosaic_0001>
module attributes {stable_mosaic.version = 11 : i64} {
  func.func @_flash_attn_ln_kernel(%arg0: i32, %arg1: i32, %arg2: i32, %arg3: memref<1x16x128xf32, #tpu.memory_space<vmem>>, %arg4: memref<1x16x128xf32, #tpu.memory_space<vmem>>, %arg5: memref<1x16x128xf32, #tpu.memory_space<vmem>>, %arg6: memref<1x16x128xf32, #tpu.memory_space<vmem>>, %arg7: memref<1x128x32xbf16, #tpu.memory_space<vmem>>, %arg8: memref<1x128x32xbf16, #tpu.memory_space<vmem>>, %arg9: memref<1x128x32xbf16, #tpu.memory_space<vmem>>, %arg10: memref<1x32x128xbf16, #tpu.memory_space<vmem>>, %arg11: memref<1x128xf32, #tpu.memory_space<vmem>>, %arg12: memref<1x128xf32, #tpu.memory_space<vmem>>, %arg13: memref<1x128xf32, #tpu.memory_space<vmem>>, %arg14: memref<1x16x128xbf16, #tpu.memory_space<vmem>>, %arg15: memref<4x16x32xbf16, #tpu.memory_space<vmem>>, %arg16: memref<4x16x1xf32, #tpu.memory_space<vmem>>, %arg17: memref<4x16x1xf32, #tpu.memory_space<vmem>>, %arg18: memref<4x16x32xf32, #tpu.memory_space<vmem>>, %arg19: memref<16x128xf32, #tpu.memory_space<vmem>>) attributes {dimension_semantics = [#tpu.dimension_semantics<parallel>, #tpu.dimension_semantics<arbitrary>, #tpu.dimension_semantics<arbitrary>], iteration_bounds = array<i64: 2, 1, 4>, scalar_prefetch = 0 : i64, scratch_operands = 5 : i64, tpu.core_type = #tpu.core_type<tc>, window_params = [{transform_indices = @transform_0, window_bounds = array<i64: 1, 16, 128>}, {transform_indices = @transform_1, window_bounds = array<i64: 1, 16, 128>}, {transform_indices = @transform_2, window_bounds = array<i64: 1, 16, 128>}, {transform_indices = @transform_3, window_bounds = array<i64: 1, 16, 128>}, {transform_indices = @transform_4, window_bounds = array<i64: 1, 128, 32>}, {transform_indices = @transform_5, window_bounds = array<i64: 1, 128, 32>}, {transform_indices = @transform_6, window_bounds = array<i64: 1, 128, 32>}, {transform_indices = @transform_7, window_bounds = array<i64: 1, 32, 128>}, {pipeline_mode = #tpu.pipeline_mode<synchronous>, transform_indices = @transform_8, window_bounds = array<i64: 1, 128>}, {pipeline_mode = #tpu.pipeline_mode<synchronous>, transform_indices = @transform_9, window_bounds = array<i64: 1, 128>}, {pipeline_mode = #tpu.pipeline_mode<synchronous>, transform_indices = @transform_10, window_bounds = array<i64: 1, 128>}, {transform_indices = @transform_11, window_bounds = array<i64: 1, 16, 128>}]} {
    %c0_i32 = arith.constant 0 : i32
    %0 = arith.cmpi eq, %arg1, %c0_i32 : i32
    %c0_i32_0 = arith.constant 0 : i32
    %1 = arith.cmpi eq, %arg1, %c0_i32_0 : i32
    %2 = arith.extui %1 : i1 to i32
    %c0_i32_1 = arith.constant 0 : i32
    %3 = arith.cmpi ne, %2, %c0_i32_1 : i32
    scf.if %3 {
      %cst_36 = arith.constant 0xFF800000 : f32
      %70 = vector.broadcast %cst_36 : f32 to vector<16x1xf32>
      %71 = arith.index_cast %arg2 : i32 to index
      %c0_37 = arith.constant 0 : index
      %c0_38 = arith.constant 0 : index
      %72 = vector.load %arg16[%71, %c0_37, %c0_38] : memref<4x16x1xf32, #tpu.memory_space<vmem>>, vector<1x16x1xf32>
      %73 = vector.shape_cast %72 : vector<1x16x1xf32> to vector<16x1xf32>
      %74 = vector.shape_cast %70 : vector<16x1xf32> to vector<1x16x1xf32>
      tpu.vector_store %arg16[%71, %c0_37, %c0_38], %74 {strides = array<i32>} : memref<4x16x1xf32, #tpu.memory_space<vmem>>, vector<1x16x1xf32>,
      %cst_39 = arith.constant 0.000000e+00 : f32
      %75 = vector.broadcast %cst_39 : f32 to vector<16x1xf32>
      %76 = arith.index_cast %arg2 : i32 to index
      %c0_40 = arith.constant 0 : index
      %c0_41 = arith.constant 0 : index
      %77 = vector.load %arg17[%76, %c0_40, %c0_41] : memref<4x16x1xf32, #tpu.memory_space<vmem>>, vector<1x16x1xf32>
      %78 = vector.shape_cast %77 : vector<1x16x1xf32> to vector<16x1xf32>
      %79 = vector.shape_cast %75 : vector<16x1xf32> to vector<1x16x1xf32>
      tpu.vector_store %arg17[%76, %c0_40, %c0_41], %79 {strides = array<i32>} : memref<4x16x1xf32, #tpu.memory_space<vmem>>, vector<1x16x1xf32>,
      %cst_42 = arith.constant 0.000000e+00 : f32
      %80 = vector.broadcast %cst_42 : f32 to vector<16x32xf32>
      %81 = arith.index_cast %arg2 : i32 to index
      %c0_43 = arith.constant 0 : index
      %c0_44 = arith.constant 0 : index
      %82 = vector.load %arg18[%81, %c0_43, %c0_44] : memref<4x16x32xf32, #tpu.memory_space<vmem>>, vector<1x16x32xf32>
      %83 = vector.shape_cast %82 : vector<1x16x32xf32> to vector<16x32xf32>
      %84 = vector.shape_cast %80 : vector<16x32xf32> to vector<1x16x32xf32>
      tpu.vector_store %arg18[%81, %c0_43, %c0_44], %84 {strides = array<i32>} : memref<4x16x32xf32, #tpu.memory_space<vmem>>, vector<1x16x32xf32>,
      %c0_45 = arith.constant 0 : index
      %c0_46 = arith.constant 0 : index
      %c0_47 = arith.constant 0 : index
      %85 = vector.load %arg3[%c0_45, %c0_46, %c0_47] : memref<1x16x128xf32, #tpu.memory_space<vmem>>, vector<1x16x128xf32>
      %86 = vector.shape_cast %85 : vector<1x16x128xf32> to vector<16x128xf32>
      %87 = arith.truncf %86 : vector<16x128xf32> to vector<16x128xbf16>
      %c0_48 = arith.constant 0 : index
      %c0_49 = arith.constant 0 : index
      %c0_50 = arith.constant 0 : index
      %88 = vector.load %arg7[%c0_48, %c0_49, %c0_50] : memref<1x128x32xbf16, #tpu.memory_space<vmem>>, vector<1x128x32xbf16>
      %89 = vector.shape_cast %88 : vector<1x128x32xbf16> to vector<128x32xbf16>
      %cst_51 = arith.constant dense<0.000000e+00> : vector<16x32xf32>
      %90 = tpu.matmul %87, %89, %cst_51 {dimension_numbers = #tpu.dot_dimension_numbers<[1], [0], [0], [1], [0, 0, 1, 1], [], []>} : vector<16x128xbf16>, vector<128x32xbf16>, vector<16x32xf32> -> vector<16x32xf32>
      %91 = arith.truncf %90 : vector<16x32xf32> to vector<16x32xbf16>
      %92 = arith.index_cast %arg2 : i32 to index
      %c0_52 = arith.constant 0 : index
      %c0_53 = arith.constant 0 : index
      %93 = vector.load %arg15[%92, %c0_52, %c0_53] : memref<4x16x32xbf16, #tpu.memory_space<vmem>>, vector<1x16x32xbf16>
      %94 = vector.shape_cast %93 : vector<1x16x32xbf16> to vector<16x32xbf16>
      %95 = vector.shape_cast %91 : vector<16x32xbf16> to vector<1x16x32xbf16>
      tpu.vector_store %arg15[%92, %c0_52, %c0_53], %95 {strides = array<i32>} : memref<4x16x32xbf16, #tpu.memory_space<vmem>>, vector<1x16x32xbf16>,
    } else {
    }
    %c0_i32_2 = arith.constant 0 : i32
    %4 = arith.cmpi eq, %arg2, %c0_i32_2 : i32
    %5 = arith.andi %0, %4 : i1
    %6 = arith.extui %5 : i1 to i32
    %c0_i32_3 = arith.constant 0 : i32
    %7 = arith.cmpi ne, %6, %c0_i32_3 : i32
    scf.if %7 {
      %cst_36 = arith.constant 0.000000e+00 : f32
      %70 = vector.broadcast %cst_36 : f32 to vector<16x128xf32>
      %c0_37 = arith.constant 0 : index
      %c0_38 = arith.constant 0 : index
      %71 = vector.load %arg19[%c0_37, %c0_38] : memref<16x128xf32, #tpu.memory_space<vmem>>, vector<16x128xf32>
      tpu.vector_store %arg19[%c0_37, %c0_38], %70 {strides = array<i32>} : memref<16x128xf32, #tpu.memory_space<vmem>>, vector<16x128xf32>,
    } else {
    }
    %c0 = arith.constant 0 : index
    %c0_4 = arith.constant 0 : index
    %c0_5 = arith.constant 0 : index
    %8 = vector.load %arg4[%c0, %c0_4, %c0_5] : memref<1x16x128xf32, #tpu.memory_space<vmem>>, vector<1x16x128xf32>
    %9 = vector.shape_cast %8 : vector<1x16x128xf32> to vector<16x128xf32>
    %10 = arith.truncf %9 : vector<16x128xf32> to vector<16x128xbf16>
    %c0_6 = arith.constant 0 : index
    %c0_7 = arith.constant 0 : index
    %c0_8 = arith.constant 0 : index
    %11 = vector.load %arg8[%c0_6, %c0_7, %c0_8] : memref<1x128x32xbf16, #tpu.memory_space<vmem>>, vector<1x128x32xbf16>
    %12 = vector.shape_cast %11 : vector<1x128x32xbf16> to vector<128x32xbf16>
    %cst = arith.constant dense<0.000000e+00> : vector<16x32xf32>
    %13 = tpu.matmul %10, %12, %cst {dimension_numbers = #tpu.dot_dimension_numbers<[1], [0], [0], [1], [0, 0, 1, 1], [], []>} : vector<16x128xbf16>, vector<128x32xbf16>, vector<16x32xf32> -> vector<16x32xf32>
    %c0_9 = arith.constant 0 : index
    %c0_10 = arith.constant 0 : index
    %c0_11 = arith.constant 0 : index
    %14 = vector.load %arg5[%c0_9, %c0_10, %c0_11] : memref<1x16x128xf32, #tpu.memory_space<vmem>>, vector<1x16x128xf32>
    %15 = vector.shape_cast %14 : vector<1x16x128xf32> to vector<16x128xf32>
    %16 = arith.truncf %15 : vector<16x128xf32> to vector<16x128xbf16>
    %c0_12 = arith.constant 0 : index
    %c0_13 = arith.constant 0 : index
    %c0_14 = arith.constant 0 : index
    %17 = vector.load %arg9[%c0_12, %c0_13, %c0_14] : memref<1x128x32xbf16, #tpu.memory_space<vmem>>, vector<1x128x32xbf16>
    %18 = vector.shape_cast %17 : vector<1x128x32xbf16> to vector<128x32xbf16>
    %cst_15 = arith.constant dense<0.000000e+00> : vector<16x32xf32>
    %19 = tpu.matmul %16, %18, %cst_15 {dimension_numbers = #tpu.dot_dimension_numbers<[1], [0], [0], [1], [0, 0, 1, 1], [], []>} : vector<16x128xbf16>, vector<128x32xbf16>, vector<16x32xf32> -> vector<16x32xf32>
    %20 = arith.index_cast %arg2 : i32 to index
    %c0_16 = arith.constant 0 : index
    %c0_17 = arith.constant 0 : index
    %21 = vector.load %arg15[%20, %c0_16, %c0_17] : memref<4x16x32xbf16, #tpu.memory_space<vmem>>, vector<1x16x32xbf16>
    %22 = vector.shape_cast %21 : vector<1x16x32xbf16> to vector<16x32xbf16>
    %23 = arith.truncf %13 : vector<16x32xf32> to vector<16x32xbf16>
    %cst_18 = arith.constant dense<0.000000e+00> : vector<16x16xf32>
    %24 = tpu.matmul %22, %23, %cst_18 {dimension_numbers = #tpu.dot_dimension_numbers<[1], [1], [0], [0], [0, 0, 1, 0], [], []>} : vector<16x32xbf16>, vector<16x32xbf16>, vector<16x16xf32> -> vector<16x16xf32>
    %25 = arith.index_cast %arg2 : i32 to index
    %c0_19 = arith.constant 0 : index
    %c0_20 = arith.constant 0 : index
    %26 = vector.load %arg16[%25, %c0_19, %c0_20] : memref<4x16x1xf32, #tpu.memory_space<vmem>>, vector<1x16x1xf32>
    %27 = vector.shape_cast %26 : vector<1x16x1xf32> to vector<16x1xf32>
    %cst_21 = arith.constant dense<0xFF800000> : vector<16xf32>
    %28 = vector.multi_reduction <maximumf>, %24, %cst_21 [1] : vector<16x16xf32> to vector<16xf32>
    %29 = vector.shape_cast %28 : vector<16xf32> to vector<16x1xf32>
    %30 = arith.maximumf %27, %29 : vector<16x1xf32>
    %31 = arith.subf %27, %30 : vector<16x1xf32>
    %32 = math.exp %31 : vector<16x1xf32>
    %33 = vector.broadcast %30 : vector<16x1xf32> to vector<16x16xf32>
    %34 = arith.subf %24, %33 : vector<16x16xf32>
    %35 = math.exp %34 : vector<16x16xf32>
    %36 = arith.index_cast %arg2 : i32 to index
    %c0_22 = arith.constant 0 : index
    %c0_23 = arith.constant 0 : index
    %37 = vector.load %arg17[%36, %c0_22, %c0_23] : memref<4x16x1xf32, #tpu.memory_space<vmem>>, vector<1x16x1xf32>
    %38 = vector.shape_cast %37 : vector<1x16x1xf32> to vector<16x1xf32>
    %39 = arith.mulf %32, %38 : vector<16x1xf32>
    %cst_24 = arith.constant dense<0.000000e+00> : vector<16xf32>
    %40 = vector.multi_reduction <add>, %35, %cst_24 [1] : vector<16x16xf32> to vector<16xf32>
    %41 = vector.shape_cast %40 : vector<16xf32> to vector<16x1xf32>
    %42 = arith.addf %39, %41 : vector<16x1xf32>
    %43 = arith.index_cast %arg2 : i32 to index
    %c0_25 = arith.constant 0 : index
    %c0_26 = arith.constant 0 : index
    %44 = vector.load %arg17[%43, %c0_25, %c0_26] : memref<4x16x1xf32, #tpu.memory_space<vmem>>, vector<1x16x1xf32>
    %45 = vector.shape_cast %44 : vector<1x16x1xf32> to vector<16x1xf32>
    %46 = vector.shape_cast %42 : vector<16x1xf32> to vector<1x16x1xf32>
    tpu.vector_store %arg17[%43, %c0_25, %c0_26], %46 {strides = array<i32>} : memref<4x16x1xf32, #tpu.memory_space<vmem>>, vector<1x16x1xf32>,
    %47 = arith.index_cast %arg2 : i32 to index
    %c0_27 = arith.constant 0 : index
    %c0_28 = arith.constant 0 : index
    %48 = vector.load %arg18[%47, %c0_27, %c0_28] : memref<4x16x32xf32, #tpu.memory_space<vmem>>, vector<1x16x32xf32>
    %49 = vector.shape_cast %48 : vector<1x16x32xf32> to vector<16x32xf32>
    %50 = vector.broadcast %32 : vector<16x1xf32> to vector<16x32xf32>
    %51 = arith.mulf %50, %49 : vector<16x32xf32>
    %52 = arith.truncf %35 : vector<16x16xf32> to vector<16x16xbf16>
    %53 = arith.truncf %19 : vector<16x32xf32> to vector<16x32xbf16>
    %cst_29 = arith.constant dense<0.000000e+00> : vector<16x32xf32>
    %54 = tpu.matmul %52, %53, %cst_29 {dimension_numbers = #tpu.dot_dimension_numbers<[1], [0], [0], [1], [0, 0, 1, 1], [], []>} : vector<16x16xbf16>, vector<16x32xbf16>, vector<16x32xf32> -> vector<16x32xf32>
    %55 = arith.addf %51, %54 : vector<16x32xf32>
    %56 = arith.index_cast %arg2 : i32 to index
    %c0_30 = arith.constant 0 : index
    %c0_31 = arith.constant 0 : index
    %57 = vector.load %arg18[%56, %c0_30, %c0_31] : memref<4x16x32xf32, #tpu.memory_space<vmem>>, vector<1x16x32xf32>
    %58 = vector.shape_cast %57 : vector<1x16x32xf32> to vector<16x32xf32>
    %59 = vector.shape_cast %55 : vector<16x32xf32> to vector<1x16x32xf32>
    tpu.vector_store %arg18[%56, %c0_30, %c0_31], %59 {strides = array<i32>} : memref<4x16x32xf32, #tpu.memory_space<vmem>>, vector<1x16x32xf32>,
    %60 = arith.index_cast %arg2 : i32 to index
    %c0_32 = arith.constant 0 : index
    %c0_33 = arith.constant 0 : index
    %61 = vector.load %arg16[%60, %c0_32, %c0_33] : memref<4x16x1xf32, #tpu.memory_space<vmem>>, vector<1x16x1xf32>
    %62 = vector.shape_cast %61 : vector<1x16x1xf32> to vector<16x1xf32>
    %63 = vector.shape_cast %30 : vector<16x1xf32> to vector<1x16x1xf32>
    tpu.vector_store %arg16[%60, %c0_32, %c0_33], %63 {strides = array<i32>} : memref<4x16x1xf32, #tpu.memory_space<vmem>>, vector<1x16x1xf32>,
    %64 = arith.extui %0 : i1 to i32
    %c0_i32_34 = arith.constant 0 : i32
    %65 = arith.cmpi ne, %64, %c0_i32_34 : i32
    scf.if %65 {
      %70 = arith.index_cast %arg2 : i32 to index
      %c0_36 = arith.constant 0 : index
      %c0_37 = arith.constant 0 : index
      %71 = vector.load %arg18[%70, %c0_36, %c0_37] : memref<4x16x32xf32, #tpu.memory_space<vmem>>, vector<1x16x32xf32>
      %72 = vector.shape_cast %71 : vector<1x16x32xf32> to vector<16x32xf32>
      %73 = arith.index_cast %arg2 : i32 to index
      %c0_38 = arith.constant 0 : index
      %c0_39 = arith.constant 0 : index
      %74 = vector.load %arg17[%73, %c0_38, %c0_39] : memref<4x16x1xf32, #tpu.memory_space<vmem>>, vector<1x16x1xf32>
      %75 = vector.shape_cast %74 : vector<1x16x1xf32> to vector<16x1xf32>
      %76 = tpu.reciprocal %75 {approx = true} : vector<16x1xf32> -> vector<16x1xf32>
      %77 = vector.broadcast %76 : vector<16x1xf32> to vector<16x32xf32>
      %78 = arith.mulf %72, %77 : vector<16x32xf32>
      %c0_40 = arith.constant 0 : index
      %c0_41 = arith.constant 0 : index
      %79 = vector.load %arg19[%c0_40, %c0_41] : memref<16x128xf32, #tpu.memory_space<vmem>>, vector<16x128xf32>
      %80 = arith.truncf %78 : vector<16x32xf32> to vector<16x32xbf16>
      %c0_42 = arith.constant 0 : index
      %c0_43 = arith.constant 0 : index
      %c0_44 = arith.constant 0 : index
      %81 = vector.load %arg10[%c0_42, %c0_43, %c0_44] : memref<1x32x128xbf16, #tpu.memory_space<vmem>>, vector<1x32x128xbf16>
      %82 = vector.shape_cast %81 : vector<1x32x128xbf16> to vector<32x128xbf16>
      %cst_45 = arith.constant dense<0.000000e+00> : vector<16x128xf32>
      %83 = tpu.matmul %80, %82, %cst_45 {dimension_numbers = #tpu.dot_dimension_numbers<[1], [0], [0], [1], [0, 0, 1, 1], [], []>} : vector<16x32xbf16>, vector<32x128xbf16>, vector<16x128xf32> -> vector<16x128xf32>
      %84 = arith.addf %79, %83 : vector<16x128xf32>
      %c0_46 = arith.constant 0 : index
      %c0_47 = arith.constant 0 : index
      %85 = vector.load %arg19[%c0_46, %c0_47] : memref<16x128xf32, #tpu.memory_space<vmem>>, vector<16x128xf32>
      tpu.vector_store %arg19[%c0_46, %c0_47], %84 {strides = array<i32>} : memref<16x128xf32, #tpu.memory_space<vmem>>, vector<16x128xf32>,
    } else {
    }
    %c3_i32 = arith.constant 3 : i32
    %66 = arith.cmpi eq, %arg2, %c3_i32 : i32
    %67 = arith.andi %0, %66 : i1
    %68 = arith.extui %67 : i1 to i32
    %c0_i32_35 = arith.constant 0 : i32
    %69 = arith.cmpi ne, %68, %c0_i32_35 : i32
    scf.if %69 {
      %c0_36 = arith.constant 0 : index
      %c0_37 = arith.constant 0 : index
      %70 = vector.load %arg19[%c0_36, %c0_37] : memref<16x128xf32, #tpu.memory_space<vmem>>, vector<16x128xf32>
      %c0_38 = arith.constant 0 : index
      %c0_39 = arith.constant 0 : index
      %71 = vector.load %arg11[%c0_38, %c0_39] : memref<1x128xf32, #tpu.memory_space<vmem>>, vector<1x128xf32>
      %72 = vector.broadcast %71 : vector<1x128xf32> to vector<16x128xf32>
      %73 = arith.addf %70, %72 : vector<16x128xf32>
      %c0_40 = arith.constant 0 : index
      %c0_41 = arith.constant 0 : index
      %c0_42 = arith.constant 0 : index
      %74 = vector.load %arg6[%c0_40, %c0_41, %c0_42] : memref<1x16x128xf32, #tpu.memory_space<vmem>>, vector<1x16x128xf32>
      %75 = vector.shape_cast %74 : vector<1x16x128xf32> to vector<16x128xf32>
      %76 = arith.addf %73, %75 : vector<16x128xf32>
      %cst_43 = arith.constant dense<0.000000e+00> : vector<16xf32>
      %77 = vector.multi_reduction <add>, %76, %cst_43 [1] : vector<16x128xf32> to vector<16xf32>
      %78 = vector.shape_cast %77 : vector<16xf32> to vector<16x1xf32>
      %cst_44 = arith.constant 1.280000e+02 : f32
      %79 = vector.broadcast %cst_44 : f32 to vector<16x1xf32>
      %80 = arith.divf %78, %79 : vector<16x1xf32>
      %81 = vector.broadcast %80 : vector<16x1xf32> to vector<16x128xf32>
      %82 = arith.subf %76, %81 : vector<16x128xf32>
      %83 = arith.mulf %82, %82 : vector<16x128xf32>
      %cst_45 = arith.constant dense<0.000000e+00> : vector<16xf32>
      %84 = vector.multi_reduction <add>, %83, %cst_45 [1] : vector<16x128xf32> to vector<16xf32>
      %85 = vector.shape_cast %84 : vector<16xf32> to vector<16x1xf32>
      %cst_46 = arith.constant 1.280000e+02 : f32
      %86 = vector.broadcast %cst_46 : f32 to vector<16x1xf32>
      %87 = arith.divf %85, %86 : vector<16x1xf32>
      %88 = vector.broadcast %80 : vector<16x1xf32> to vector<16x128xf32>
      %89 = arith.subf %76, %88 : vector<16x128xf32>
      %cst_47 = arith.constant 9.99999974E-6 : f32
      %90 = vector.broadcast %cst_47 : f32 to vector<16x1xf32>
      %91 = arith.addf %87, %90 : vector<16x1xf32>
      %92 = math.rsqrt %91 : vector<16x1xf32>
      %93 = vector.broadcast %92 : vector<16x1xf32> to vector<16x128xf32>
      %94 = arith.mulf %89, %93 : vector<16x128xf32>
      %c0_48 = arith.constant 0 : index
      %c0_49 = arith.constant 0 : index
      %95 = vector.load %arg12[%c0_48, %c0_49] : memref<1x128xf32, #tpu.memory_space<vmem>>, vector<1x128xf32>
      %96 = vector.broadcast %95 : vector<1x128xf32> to vector<16x128xf32>
      %97 = arith.mulf %94, %96 : vector<16x128xf32>
      %c0_50 = arith.constant 0 : index
      %c0_51 = arith.constant 0 : index
      %98 = vector.load %arg13[%c0_50, %c0_51] : memref<1x128xf32, #tpu.memory_space<vmem>>, vector<1x128xf32>
      %99 = vector.broadcast %98 : vector<1x128xf32> to vector<16x128xf32>
      %100 = arith.addf %97, %99 : vector<16x128xf32>
      %101 = arith.truncf %100 : vector<16x128xf32> to vector<16x128xbf16>
      %c0_52 = arith.constant 0 : index
      %c0_53 = arith.constant 0 : index
      %c0_54 = arith.constant 0 : index
      %102 = vector.load %arg14[%c0_52, %c0_53, %c0_54] : memref<1x16x128xbf16, #tpu.memory_space<vmem>>, vector<1x16x128xbf16>
      %103 = vector.shape_cast %102 : vector<1x16x128xbf16> to vector<16x128xbf16>
      %104 = vector.shape_cast %101 : vector<16x128xbf16> to vector<1x16x128xbf16>
      tpu.vector_store %arg14[%c0_52, %c0_53, %c0_54], %104 {strides = array<i32>} : memref<1x16x128xbf16, #tpu.memory_space<vmem>>, vector<1x16x128xbf16>,
    } else {
    }
    return
  }
  func.func @transform_0(%arg0: i32, %arg1: i32, %arg2: i32) -> (i32, i32, i32) {
    %c0_i32 = arith.constant 0 : i32
    %c0_i32_0 = arith.constant 0 : i32
    %c0_i32_1 = arith.constant 0 : i32
    return %arg0, %c0_i32, %c0_i32_0 : i32, i32, i32
  }
  func.func @transform_1(%arg0: i32, %arg1: i32, %arg2: i32) -> (i32, i32, i32) {
    %c0_i32 = arith.constant 0 : i32
    %c0_i32_0 = arith.constant 0 : i32
    return %arg0, %arg1, %c0_i32 : i32, i32, i32
  }
  func.func @transform_2(%arg0: i32, %arg1: i32, %arg2: i32) -> (i32, i32, i32) {
    %c0_i32 = arith.constant 0 : i32
    %c0_i32_0 = arith.constant 0 : i32
    return %arg0, %arg1, %c0_i32 : i32, i32, i32
  }
  func.func @transform_3(%arg0: i32, %arg1: i32, %arg2: i32) -> (i32, i32, i32) {
    %c0_i32 = arith.constant 0 : i32
    %c0_i32_0 = arith.constant 0 : i32
    %c0_i32_1 = arith.constant 0 : i32
    return %arg0, %c0_i32, %c0_i32_0 : i32, i32, i32
  }
  func.func @transform_4(%arg0: i32, %arg1: i32, %arg2: i32) -> (i32, i32, i32) {
    %c0_i32 = arith.constant 0 : i32
    %c0_i32_0 = arith.constant 0 : i32
    %c0_i32_1 = arith.constant 0 : i32
    return %arg2, %c0_i32, %c0_i32_0 : i32, i32, i32
  }
  func.func @transform_5(%arg0: i32, %arg1: i32, %arg2: i32) -> (i32, i32, i32) {
    %c0_i32 = arith.constant 0 : i32
    %c0_i32_0 = arith.constant 0 : i32
    %c0_i32_1 = arith.constant 0 : i32
    return %arg2, %c0_i32, %c0_i32_0 : i32, i32, i32
  }
  func.func @transform_6(%arg0: i32, %arg1: i32, %arg2: i32) -> (i32, i32, i32) {
    %c0_i32 = arith.constant 0 : i32
    %c0_i32_0 = arith.constant 0 : i32
    %c0_i32_1 = arith.constant 0 : i32
    return %arg2, %c0_i32, %c0_i32_0 : i32, i32, i32
  }
  func.func @transform_7(%arg0: i32, %arg1: i32, %arg2: i32) -> (i32, i32, i32) {
    %c0_i32 = arith.constant 0 : i32
    %c0_i32_0 = arith.constant 0 : i32
    %c0_i32_1 = arith.constant 0 : i32
    return %arg2, %c0_i32, %c0_i32_0 : i32, i32, i32
  }
  func.func @transform_8(%arg0: i32, %arg1: i32, %arg2: i32) -> (i32, i32) {
    %c0_i32 = arith.constant 0 : i32
    %c0_i32_0 = arith.constant 0 : i32
    %c0_i32_1 = arith.constant 0 : i32
    return %c0_i32, %c0_i32_0 : i32, i32
  }
  func.func @transform_9(%arg0: i32, %arg1: i32, %arg2: i32) -> (i32, i32) {
    %c0_i32 = arith.constant 0 : i32
    %c0_i32_0 = arith.constant 0 : i32
    %c0_i32_1 = arith.constant 0 : i32
    return %c0_i32, %c0_i32_0 : i32, i32
  }
  func.func @transform_10(%arg0: i32, %arg1: i32, %arg2: i32) -> (i32, i32) {
    %c0_i32 = arith.constant 0 : i32
    %c0_i32_0 = arith.constant 0 : i32
    %c0_i32_1 = arith.constant 0 : i32
    return %c0_i32, %c0_i32_0 : i32, i32
  }
  func.func @transform_11(%arg0: i32, %arg1: i32, %arg2: i32) -> (i32, i32, i32) {
    %c0_i32 = arith.constant 0 : i32
    %c0_i32_0 = arith.constant 0 : i32
    %c0_i32_1 = arith.constant 0 : i32
    return %arg0, %c0_i32, %c0_i32_0 : i32, i32, i32
  }
}

</mosaic_0001>

<bundles_post_ra>
// kernel: tpu_custom_call.1
= control target key start
LH: loop header
LB: loop body
LE: loop exit
PB: predicated region body
PF: predicated region fallthrough
CT: control target
= control target key end

     0   :  { %s3536_s0 = inlined_call_operand.hbm [shape: f32[2,16,128], index: 0, kind: input, shape index: {}]   ;;  %s3537_s1 = inlined_call_operand.hbm [shape: f32[2,16,128], index: 1, kind: input, shape index: {}]   ;;  %s3538_s2 = inlined_call_operand.hbm [shape: f32[2,16,128], index: 2, kind: input, shape index: {}]   ;;  %s3539_s3 = inlined_call_operand.hbm [shape: f32[2,16,128], index: 3, kind: input, shape index: {}]   ;;  %s3540_s4 = inlined_call_operand.hbm [shape: bf16[4,128,32], index: 4, kind: input, shape index: {}]   ;;  %s3541_s5 = inlined_call_operand.hbm [shape: bf16[4,128,32], index: 5, kind: input, shape index: {}]   ;;  %s3542_s6 = inlined_call_operand.hbm [shape: bf16[4,128,32], index: 6, kind: input, shape index: {}]   ;;  %s3543_s7 = inlined_call_operand.hbm [shape: bf16[4,32,128], index: 7, kind: input, shape index: {}]   ;;  %s3544_s8 = inlined_call_operand.hbm [shape: f32[1,128], index: 8, kind: input, shape index: {}]   ;;  %s3545_s9 = inlined_call_operand.hbm [shape: f32[1,128], index: 9, kind: input, shape index: {}]   ;;  %s3546_s10 = inlined_call_operand.hbm [shape: f32[1,128], index: 10, kind: input, shape index: {}]   ;;  %s3547_s11 = inlined_call_operand.hbm [shape: bf16[2,16,128], index: 11, kind: output, shape index: {}]  }
   0x1   :  { %3596 = sst [smem:[#allocation53_spill]] %s3537_s1 }
   0x2   :  { %3597 = sst [smem:[#allocation54_spill]] %s3539_s3 }
   0x3   :  { %3598 = sst [smem:[#allocation55_spill]] %s3541_s5 }
   0x4   :  { %3599 = sst [smem:[#allocation56_spill]] %s3542_s6 }
   0x5   :  { %3600 = sst [smem:[#allocation57_spill]] %s3543_s7 }
   0x6   :  { %3601 = sst [smem:[#allocation58_spill]] %s3544_s8 }
   0x7   :  { %3602 = sst [smem:[#allocation59_spill]] %s3545_s9 }
   0x8   :  { %3603 = sst [smem:[#allocation60_spill]] %s3547_s11 }
   0x9   :  { %16 = vsyncpa [#allocation8], 0 }
   0xa   :  { %18 = vsyncpa [#allocation8 + $0x1], 0 }
   0xb   :  { %19 = vsyncpa [#allocation11], 0 }
   0xc   :  { %21 = vsyncpa [#allocation11 + $0x1], 0 }
   0xd   :  { %22 = vsyncpa [#allocation14], 0 }
   0xe   :  { %24 = vsyncpa [#allocation14 + $0x1], 0 }
   0xf   :  { %25 = vsyncpa [#allocation17], 0 }
  0x10   :  { %27 = vsyncpa [#allocation17 + $0x1], 0 }
  0x11   :  { %28 = vsyncpa [#allocation20], 0 }
  0x12   :  { %30 = vsyncpa [#allocation20 + $0x1], 0 }
  0x13   :  { %31 = vsyncpa [#allocation23], 0 }
  0x14   :  { %32 = vsyncpa [#allocation9], 0 }
  0x15   :  { %34 = vsyncpa [#allocation9 + $0x1], 0  ;;  %s2729_s17 = smov 0   ;;  %s2731_s18 = smov 0  }
  0x16   :  { %s2733_s19 = smov 0   ;;  %s2735_s20 = smov 0  }
  0x17   :  { %s2737_s21 = smov 0   ;;  %s2739_s22 = smov 0  }
  0x18   :  { %s2741_s23 = smov 0   ;;  %s2743_s24 = smov 0  }
  0x19   :  { %s2745_s25 = smov 0   ;;  %s2747_s26 = smov 0  }
  0x1a   :  { %s2749_s27 = smov 0  }
  0x1b LB: > { %3604 = sst [smem:[#allocation35_spill]] %s2608_s18  ;;  %s2783_s28 = sadd.s32 4294967295, %s2644_s27   ;;  %s2644_s27 = sphi %s2749_s27, %s40_s27   ;;  %s2640_s26 = sphi %s2747_s26, %s3692_s26   ;;  %s2636_s25 = sphi %s2745_s25, %s3691_s25   ;;  %s2632_s24 = sphi %s2743_s24, %s3697_s24   ;;  %s2628_s23 = sphi %s2741_s23, %s3689_s23   ;;  %s2624_s22 = sphi %s2739_s22, %s3696_s22   ;;  %s2620_s21 = sphi %s2737_s21, %s3695_s21   ;;  %s2616_s20 = sphi %s2735_s20, %s3687_s20   ;;  %s2612_s19 = sphi %s2733_s19, %s3694_s19   ;;  %s2608_s18 = sphi %s2731_s18, %s3693_s18   ;;  %s2604_s17 = sphi %s2729_s17, %s3685_s17  }
  0x1c   : > { %3605 = sst [smem:[#allocation36_spill]] %s2616_s20  ;;  %s1727_s29 = sadd.s32 4294967294, %s2644_s27  }
  0x1d   : > { %3606 = sst [smem:[#allocation37_spill]] %s2620_s21  ;;  %p79_p0 = scmp.ne.s32.totalorder %s2620_s21, %s2616_s20 }
  0x1e   : > { %3607 = sst [smem:[#allocation38_spill]] %s2628_s23  ;;  %p3556_p1 = scmp.eq.s32.totalorder %s2783_s28, 0 }
  0x1f   : > { %3608 = sst [smem:[#allocation39_spill]] %s2632_s24  ;;  %p187_p2 = scmp.ne.s32.totalorder %s2608_s18, %s2604_s17 }
  0x20   : > { %3609 = sst [smem:[#allocation40_spill]] %s2636_s25  ;;  %p2793_p4 = por %p3556_p1, %p79_p0 }
  0x21   : > { %3610 = sst [smem:[#allocation41_spill]] %s2640_s26  ;;  %p358_p5 = scmp.eq.s32.totalorder %s1727_s29, 7 }
  0x22   : > { %3611 = sst [smem:[#allocation42_spill]] %s2644_s27  ;;  %p2799_p6 = por %p187_p2, %p3556_p1 }
  0x23   : > { %3612 = sst [smem:[#allocation43_spill]] %s2783_s28  ;;  %p1728_p7 = scmp.ge.s32.totalorder %s2644_s27, 1 }
  0x24   : > { %s3613_s30 = scalar_select %p2793_p4, 1, 0 }
  0x25   : > { %s3615_s12 = scalar_select %p2799_p6, 1, 0 }
  0x26   : > { %3614 = sst [smem:[#allocation44_spill]] %s3613_s30  ;;  %p2804_p8 = por %p358_p5, %p79_p0 }
  0x27   : > { %3616 = sst [smem:[#allocation45_spill]] %s3615_s12  ;;  %p365_p9 = scmp.lt.s32.totalorder %s2644_s27, 9 }
  0x28   : > { %s3617_s13 = scalar_select %p2804_p8, 1, 0 }
  0x29   : > { %p2809_p10 = pnand %p1728_p7, %p365_p9  ;;  %s2646_s15 = smov [#allocation21]  }
  0x2a   : > { %3618 = sst [smem:[#allocation46_spill]] %s3617_s13  ;;  %s378_s16 = sshll.u32 %s2646_s15, 4  ;;  %s379_s16 = int_to_ptr.vmem [resolvable:$true] %s378_s16 }
  0x2b   : > { %s3619_s14 = scalar_select %p2809_p10, 1, 0 }
  0x2c   : > { %p1977_p11 = pneg %p2809_p10  ;;  %s2647_s17 = smov [#allocation22]  }
  0x2d   : > { %3620 = sst [smem:[#allocation47_spill]] %s3619_s14  ;;  %s389_s29 = sshll.u32 %s2647_s17, 4  ;;  %s2821_s29 = int_to_ptr.vmem [resolvable:$true] %s389_s29 }
  0x2e   : > { %p2817_p12 = pnand %p1977_p11, %p3556_p1  ;;  %s3622_s8 = sld [smem:[#allocation58_spill]] }
  0x30   : > { %s3621_s20 = scalar_select %p2817_p12, 1, 0 }
  0x31   : > { %p2831_p0 = pneg %p2817_p12 }
  0x33   : > { %s3623_s15 = scalar_select %p2831_p0, 1, 0 }
  0x34   : > { %s2170_s24 = scalar_lea.hbm %s3622_s8, 16 }
  0x35   : > { %p2171_p13 = scmp.ne.s32.totalorder %s3622_s8, %s2170_s24  ;;  %p2177_p7 = scmp.lt.u32.totalorder %s2170_s24, %s3622_s8 }
  0x37   : > { %p2173_p2 = pnand %p2831_p0, %p2171_p13 }
  0x39   : > { %p2174_p5 = pneg %p2173_p2 }
  0x3b   : > { %p2179_p9 = pnand %p2177_p7, %p2174_p5 }
  0x3d   : > { %2182 = shalt.err (!%p2179_p9)
}
  0x3e   : > { %s2183_s11 = scalar_lea.vmem %s379_s16, 16  ;;  %s2190_s23 = scalar_lea.vmem %s379_s16, 32 }
  0x3f   : > { %p2184_p11 = scmp.ne.s32.totalorder %s379_s16, %s2183_s11  ;;  %p2191_p8 = scmp.lt.s32.totalorder %s379_s16, %s379_s16 }
  0x40   : > { %p2192_p6 = scmp.lt.s32.totalorder %s2190_s23, %s2183_s11 }
  0x41   : > { %p2186_p1 = pnand %p2184_p11, %p2831_p0 }
  0x42   : > { %p2193_p4 = por %p2192_p6, %p2191_p8 }
  0x43   : > { %p2187_p3 = pneg %p2186_p1 }
  0x45   : > { %p2194_p10 = pnand %p2193_p4, %p2187_p3 }
  0x47   : > { %2197 = shalt.err (!%p2194_p10)
}
  0x48   : > { %1980 = dma.hbm_to_vmem [thread:$0]  (!%p2817_p12), %s3622_s8, 16, %s379_s16, [#allocation20]  }
  0x49   : > { %s3624_s9 = sld [smem:[#allocation59_spill]] }
  0x4f   : > { %s2198_s17 = scalar_lea.hbm %s3624_s9, 16 }
  0x50   : > { %p2199_p1 = scmp.ne.s32.totalorder %s3624_s9, %s2198_s17  ;;  %p2205_p3 = scmp.lt.u32.totalorder %s2198_s17, %s3624_s9 }
  0x52   : > { %p2201_p13 = pnand %p2199_p1, %p2831_p0 }
  0x54   : > { %p2202_p6 = pneg %p2201_p13 }
  0x56   : > { %p2207_p4 = pnand %p2205_p3, %p2202_p6 }
  0x58   : > { %2210 = shalt.err (!%p2207_p4)
}
  0x59   : > { %s2211_s16 = scalar_lea.vmem %s2821_s29, 16  ;;  %s2218_s7 = scalar_lea.vmem %s2821_s29, 32 }
  0x5a   : > { %p2212_p8 = scmp.ne.s32.totalorder %s2821_s29, %s2211_s16  ;;  %p2219_p5 = scmp.lt.s32.totalorder %s2821_s29, %s2821_s29 }
  0x5b   : > { %p2220_p7 = scmp.lt.s32.totalorder %s2218_s7, %s2211_s16 }
  0x5c   : > { %p2214_p10 = pnand %p2212_p8, %p2831_p0 }
  0x5d   : > { %p2221_p9 = por %p2220_p7, %p2219_p5 }
  0x5e   : > { %p2215_p2 = pneg %p2214_p10 }
  0x60   : > { %p2222_p11 = pnand %p2221_p9, %p2215_p2 }
  0x62   : > { %2225 = shalt.err (!%p2222_p11)
}
  0x63   : > { %1983 = dma.hbm_to_vmem [thread:$0]  (!%p2817_p12), %s3624_s9, 16, %s2821_s29, [#allocation23]  }
  0x64   : > { %p73_p1 = scmp.ne.s32.totalorder %s2624_s22, %s2620_s21  ;;  %p3568_p13 = scmp.eq.s32.totalorder %s2644_s27, 0 }
  0x65   : > { %p3567_p6 = scmp.lt.s32.totalorder %s2644_s27, 8  ;;  %s3562_s30 = sand.u32 1, %s2624_s22  }
  0x66   : > { %p75_p3 = por %p3568_p13, %p73_p1  ;;  %p3625_p4 = scmp.eq.s32.totalorder %s2783_s28, 7 }
  0x67   : > { %s2888_s11 = sshll.u32 %s3562_s30, 4  ;;  %s2891_s23 = sshll.u32 %s2640_s26, 8 }
  0x68   : > { %p2882_p8 = por %p3625_p4, %p73_p1  ;;  %p2895_p10 = pnand %p3567_p6, %p75_p3 }
  0x69   : > { %s2900_s16 = sand.u32 1, %s2644_s27   ;;  %s3629_s1 = sld [smem:[#allocation53_spill]] }
  0x6a   : > { %s3626_s17 = scalar_select %p2882_p8, 1, 0 }
  0x6b   : > { %s3628_s29 = scalar_select %p2895_p10, 1, 0 }
  0x6c   : > { %3627 = sst [smem:[#allocation48_spill]] %s3626_s17  ;;  %s436_s30 = scalar_lea.vmem [#allocation10], %s2888_s11 }
  0x6d   : > { %s445_s24 = sshll.u32 %s436_s30, 4  ;;  %p2916_p5 = pneg %p2895_p10  ;;  %s2909_s24 = int_to_ptr.vmem [resolvable:$true] %s445_s24 }
  0x6f   : > { %s2906_s12 = scalar_lea.hbm %s3629_s1, %s2891_s23  ;;  %s2231_s17 = scalar_lea.hbm %s3629_s1, 512 }
  0x70   : > { %s2226_s8 = scalar_lea.hbm %s2906_s12, 256  ;;  %p2232_p11 = scmp.lt.u32.totalorder %s2906_s12, %s3629_s1 }
  0x71   : > { %p2227_p2 = scmp.ne.s32.totalorder %s2906_s12, %s2226_s8  ;;  %p2233_p1 = scmp.lt.u32.totalorder %s2231_s17, %s2226_s8 }
  0x72   : > { %s3630_s9 = scalar_select %p2916_p5, 1, 0 }
  0x73   : > { %p2229_p7 = pnand %p2916_p5, %p2227_p2  ;;  %p2234_p3 = por %p2233_p1, %p2232_p11 }
  0x74   : > { %p2235_p4 = scmp.lt.u32.totalorder %s2226_s8, %s2906_s12 }
  0x75   : > { %p2230_p9 = pneg %p2229_p7 }
  0x76   : > { %p2236_p6 = por %p2235_p4, %p2234_p3 }
  0x78   : > { %p2237_p13 = pnand %p2236_p6, %p2230_p9 }
  0x7a   : > { %2240 = shalt.err (!%p2237_p13)
}
  0x7b   : > { %s2241_s13 = scalar_lea.vmem %s2909_s24, 256  ;;  %s2648_s7 = smov [#allocation10]  }
  0x7c   : > { %p2242_p2 = scmp.ne.s32.totalorder %s2909_s24, %s2241_s13  ;;  %s2246_s14 = sshll.u32 %s2648_s7, 4  ;;  %s2247_s14 = int_to_ptr.vmem [resolvable:$false] %s2246_s14 }
  0x7d   : > { %s2248_s28 = scalar_lea.vmem %s2247_s14, 512  ;;  %p2249_p12 = scmp.lt.s32.totalorder %s2909_s24, %s2247_s14 }
  0x7e   : > { %p2244_p7 = pnand %p2242_p2, %p2916_p5  ;;  %p2250_p0 = scmp.lt.s32.totalorder %s2248_s28, %s2241_s13 }
  0x80   : > { %p2245_p8 = pneg %p2244_p7  ;;  %p2251_p11 = por %p2250_p0, %p2249_p12 }
  0x82   : > { %p2252_p1 = pnand %p2251_p11, %p2245_p8 }
  0x84   : > { %2255 = shalt.err (!%p2252_p1)
}
  0x85   : > { %s3577_s8 = smov 128   ;;  %s3579_s17 = smov 8  }
  0x86   : > { %s3631_s30 = scalar_lea.sflag [#allocation11], %s2900_s16  ;;  %s3632_s3 = sld [smem:[#allocation54_spill]] }
  0x87   : > { %1993 = dma.hbm_to_vmem [thread:$0]  (!%p2895_p10), %s2906_s12, 256, %s2909_s24, %s3631_s30, %s3577_s8, %s3577_s8, %s3579_s17  }
  0x88   : > { %s482_s28 = scalar_lea.vmem [#allocation13], %s2888_s11  ;;  %s3576_s21 = scalar_lea.sflag [#allocation14], %s2900_s16 }
  0x89   : > { %s489_s1 = sshll.u32 %s482_s28, 4  ;;  %s2951_s1 = int_to_ptr.vmem [resolvable:$true] %s489_s1 }
  0x8c   : > { %s2948_s14 = scalar_lea.hbm %s3632_s3, %s2891_s23  ;;  %s2261_s30 = scalar_lea.hbm %s3632_s3, 512 }
  0x8d   : > { %s2256_s6 = scalar_lea.hbm %s2948_s14, 256  ;;  %p2262_p6 = scmp.lt.u32.totalorder %s2948_s14, %s3632_s3 }
  0x8e   : > { %p2257_p12 = scmp.ne.s32.totalorder %s2948_s14, %s2256_s6  ;;  %p2263_p8 = scmp.lt.u32.totalorder %s2261_s30, %s2256_s6 }
  0x8f   : > { %p2265_p3 = scmp.lt.u32.totalorder %s2256_s6, %s2948_s14 }
  0x90   : > { %p2259_p0 = pnand %p2257_p12, %p2916_p5  ;;  %p2264_p9 = por %p2263_p8, %p2262_p6 }
  0x92   : > { %p2260_p13 = pneg %p2259_p0  ;;  %p2266_p4 = por %p2265_p3, %p2264_p9 }
  0x94   : > { %p2267_p2 = pnand %p2266_p4, %p2260_p13 }
  0x96   : > { %2270 = shalt.err (!%p2267_p2)
}
  0x97   : > { %s2271_s28 = scalar_lea.vmem %s2951_s1, 256  ;;  %s2651_s24 = smov [#allocation13]  }
  0x98   : > { %p2272_p7 = scmp.ne.s32.totalorder %s2951_s1, %s2271_s28  ;;  %s2276_s12 = sshll.u32 %s2651_s24, 4  ;;  %s2277_s12 = int_to_ptr.vmem [resolvable:$false] %s2276_s12 }
  0x99   : > { %s2278_s13 = scalar_lea.vmem %s2277_s12, 512  ;;  %p2279_p12 = scmp.lt.s32.totalorder %s2951_s1, %s2277_s12 }
  0x9a   : > { %p2274_p11 = pnand %p2272_p7, %p2916_p5  ;;  %p2280_p0 = scmp.lt.s32.totalorder %s2278_s13, %s2271_s28 }
  0x9c   : > { %p2275_p1 = pneg %p2274_p11  ;;  %p2281_p6 = por %p2280_p0, %p2279_p12 }
  0x9e   : > { %p2282_p8 = pnand %p2281_p6, %p2275_p1 }
  0xa0   : > { %2285 = shalt.err (!%p2282_p8)
}
  0xa1   : > { %1999 = dma.hbm_to_vmem [thread:$0]  (!%p2895_p10), %s2948_s14, 256, %s2951_s1, %s3576_s21, %s3577_s8, %s3577_s8, %s3579_s17  }
  0xa2   : > { %s174_s6 = sadd.s32 1, %s2612_s19  ;;  %s52_s30 = sadd.s32 1, %s2636_s25 }
  0xa3   : > { %p181_p13 = scmp.ne.s32.totalorder %s2612_s19, %s2608_s18  ;;  %p53_p9 = scmp.ge.s32.totalorder %s52_s30, 4 }
  0xa4   : > { %s3575_s7 = sand.u32 1, %s2612_s19   ;;  %p3633_p3 = scmp.eq.s32.totalorder %s2644_s27, 0 }
  0xa5   : > { %s2989_s28 = sshll.u32 %s3575_s7, 6  ;;  %s3699_s30 = smov (%p53_p9, %s52_s30), 0 }
  0xa6   : > { %p183_p4 = por %p181_p13, %p3633_p3  ;;  %3634 = sst [smem:[#allocation49_spill]] %s3699_s30 }
  0xa7   : > { %s3635_s24 = sadd.s32 1, %s2640_s26  ;;  %s171_s1 = ssub.s32 %s2636_s25, %s3699_s30 }
  0xa8   : > { %s3701_s24 = smov (!%p53_p9, %s3635_s24), %s2640_s26  ;;  %s2999_s14 = sshll.u32 %s2636_s25, 10 }
  0xa9   : > { %p61_p2 = scmp.ge.s32.totalorder %s3701_s24, 2  ;;  %p172_p7 = scmp.eq.s32.totalorder %s171_s1, 0 }
  0xaa   : > { %p3636_p11 = scmp.lt.s32.totalorder %s2644_s27, 8  ;;  %s3640_s21 = sadd.s32 1, %s2624_s22 }
  0xab   : > { %s3703_s24 = smov (%p61_p2, %s3701_s24), 0  ;;  %s3642_s5 = sld [smem:[#allocation55_spill]] }
  0xac   : > { %p3003_p1 = pnand %p3636_p11, %p183_p4  ;;  %3638 = sst [smem:[#allocation50_spill]] %s3703_s24 }
  0xad   : > { %s3010_s13 = scalar_select %p172_p7, %s2612_s19, %s174_s6  }
  0xae   : > { %s3637_s12 = scalar_select %p3003_p1, 1, 0 }
  0xaf   : > { %3639 = sst [smem:[#allocation51_spill]] %s3010_s13  ;;  %s63_s7 = ssub.s32 %s2640_s26, %s3703_s24 }
  0xb0   : > { %p64_p12 = scmp.eq.s32.totalorder %s63_s7, 0  ;;  %s524_s30 = scalar_lea.vmem [#allocation16], %s2989_s28 }
  0xb1   : > { %s3023_s1 = scalar_lea.hbm %s3642_s5, %s2999_s14  ;;  %s531_s27 = sshll.u32 %s524_s30, 4  ;;  %s3026_s27 = int_to_ptr.vmem [resolvable:$true] %s531_s27 }
  0xb2   : > { %s3017_s8 = scalar_select %p64_p12, %s2624_s22, %s3640_s21  }
  0xb3   : > { %s2286_s13 = scalar_lea.hbm %s3023_s1, 1024  ;;  %p3033_p6 = pneg %p3003_p1 }
  0xb4   : > { %3641 = sst [smem:[#allocation52_spill]] %s3017_s8  ;;  %p2287_p0 = scmp.ne.s32.totalorder %s3023_s1, %s2286_s13 }
  0xb5   : > { %s3643_s21 = scalar_select %p3033_p6, 1, 0 }
  0xb6   : > { %p2289_p8 = pnand %p3033_p6, %p2287_p0  ;;  %s2291_s7 = scalar_lea.hbm %s3642_s5, 4096 }
  0xb7   : > { %p2292_p9 = scmp.lt.u32.totalorder %s3023_s1, %s3642_s5  ;;  %p2293_p3 = scmp.lt.u32.totalorder %s2291_s7, %s2286_s13 }
  0xb8   : > { %p2290_p13 = pneg %p2289_p8  ;;  %p2295_p2 = scmp.lt.u32.totalorder %s2286_s13, %s3023_s1 }
  0xb9   : > { %p2294_p4 = por %p2293_p3, %p2292_p9 }
  0xbb   : > { %p2296_p7 = por %p2295_p2, %p2294_p4 }
  0xbd   : > { %p2297_p11 = pnand %p2296_p7, %p2290_p13 }
  0xbf   : > { %2300 = shalt.err (!%p2297_p11)
}
  0xc0   : > { %s2301_s6 = scalar_lea.vmem %s3026_s27, 1024  ;;  %s2652_s3 = smov [#allocation16]  }
  0xc1   : > { %p2302_p12 = scmp.ne.s32.totalorder %s3026_s27, %s2301_s6  ;;  %s2306_s17 = sshll.u32 %s2652_s3, 4  ;;  %s2307_s17 = int_to_ptr.vmem [resolvable:$false] %s2306_s17 }
  0xc2   : > { %s2308_s24 = scalar_lea.vmem %s2307_s17, 2048  ;;  %p2309_p10 = scmp.lt.s32.totalorder %s3026_s27, %s2307_s17 }
  0xc3   : > { %p2304_p0 = pnand %p2302_p12, %p3033_p6  ;;  %p2310_p5 = scmp.lt.s32.totalorder %s2308_s24, %s2301_s6 }
  0xc5   : > { %p2305_p8 = pneg %p2304_p0  ;;  %p2311_p9 = por %p2310_p5, %p2309_p10 }
  0xc7   : > { %p2312_p3 = pnand %p2311_p9, %p2305_p8 }
  0xc9   : > { %2315 = shalt.err (!%p2312_p3)
}
  0xca   : > { %s2653_s13 = smov 64   ;;  %s2654_s7 = smov 4  }
  0xcb   : > { %s3644_s30 = scalar_lea.sflag [#allocation17], %s2900_s16  ;;  %s2655_s3 = smov [#allocation24]  }
  0xcc   : > { %2005 = dma.hbm_to_vmem [thread:$0]  (!%p3003_p1), %s3023_s1, 1024, %s3026_s27, %s3644_s30, %s2653_s13, %s2653_s13, %s2654_s7  }
  0xcd   : > { %s400_s5 = sshll.u32 %s2655_s3, 4  ;;  %s2316_s24 = scalar_lea.hbm %s3546_s10, 16  ;;  %s401_s5 = int_to_ptr.vmem [resolvable:$true] %s400_s5 }
  0xce   : > { %p2317_p10 = scmp.ne.s32.totalorder %s3546_s10, %s2316_s24  ;;  %p3645_p5 = scmp.ne.s32.totalorder %s3623_s15, 0 }
  0xcf   : > { %p2323_p2 = scmp.lt.u32.totalorder %s2316_s24, %s3546_s10 }
  0xd0   : > { %p2319_p13 = pnand %p2317_p10, %p3645_p5 }
  0xd2   : > { %p2320_p4 = pneg %p2319_p13 }
  0xd4   : > { %p2325_p7 = pnand %p2323_p2, %p2320_p4 }
  0xd6   : > { %2328 = shalt.err (!%p2325_p7)
}
  0xd7   : > { %s2329_s27 = scalar_lea.vmem %s401_s5, 16  ;;  %s2336_s1 = scalar_lea.vmem %s401_s5, 32 }
  0xd8   : > { %p2330_p11 = scmp.ne.s32.totalorder %s401_s5, %s2329_s27  ;;  %p2337_p8 = scmp.lt.s32.totalorder %s401_s5, %s401_s5 }
  0xd9   : > { %p2338_p9 = scmp.lt.s32.totalorder %s2336_s1, %s2329_s27 }
  0xda   : > { %p2332_p12 = pnand %p2330_p11, %p3645_p5 }
  0xdb   : > { %p2339_p3 = por %p2338_p9, %p2337_p8 }
  0xdc   : > { %p2333_p0 = pneg %p2332_p12 }
  0xde   : > { %p2340_p1 = pnand %p2339_p3, %p2333_p0 }
  0xe0   : > { %2343 = shalt.err (!%p2340_p1)
}
  0xe1   : > { %p3646_p10 = scmp.ne.s32.totalorder %s3621_s20, 0  ;;  %s3083_s15 = scalar_lea.hbm %s3536_s0, %s2891_s23 }
  0xe2   : > { %s415_s30 = scalar_lea.vmem [#allocation7], %s2888_s11  ;;  %s3647_s20 = sand.u32 1, %s2624_s22  }
  0xe3   : > { %1986 = dma.hbm_to_vmem [thread:$0]  (!%p3646_p10), %s3546_s10, 16, %s401_s5, [#allocation23]  }
  0xe4   : > { %s422_s3 = sshll.u32 %s415_s30, 4  ;;  %s3090_s6 = scalar_lea.sflag [#allocation8], %s3647_s20  ;;  %s3086_s3 = int_to_ptr.vmem [resolvable:$true] %s422_s3 }
  0xe5   : > { %s2344_s17 = scalar_lea.hbm %s3083_s15, 256  ;;  %p3648_p5 = scmp.ne.s32.totalorder %s3630_s9, 0 }
  0xe6   : > { %p2345_p1 = scmp.ne.s32.totalorder %s3083_s15, %s2344_s17  ;;  %s2349_s27 = scalar_lea.hbm %s3536_s0, 512 }
  0xe7   : > { %p2350_p2 = scmp.lt.u32.totalorder %s3083_s15, %s3536_s0  ;;  %p2351_p7 = scmp.lt.u32.totalorder %s2349_s27, %s2344_s17 }
  0xe8   : > { %p2347_p13 = pnand %p2345_p1, %p3648_p5  ;;  %p2353_p12 = scmp.lt.u32.totalorder %s2344_s17, %s3083_s15 }
  0xe9   : > { %p2352_p11 = por %p2351_p7, %p2350_p2 }
  0xea   : > { %p2348_p4 = pneg %p2347_p13 }
  0xeb   : > { %p2354_p0 = por %p2353_p12, %p2352_p11 }
  0xed   : > { %p2355_p8 = pnand %p2354_p0, %p2348_p4 }
  0xef   : > { %2358 = shalt.err (!%p2355_p8)
}
  0xf0   : > { %s2359_s8 = scalar_lea.vmem %s3086_s3, 256  ;;  %s2656_s18 = smov [#allocation7]  }
  0xf1   : > { %p2360_p9 = scmp.ne.s32.totalorder %s3086_s3, %s2359_s8  ;;  %s2364_s25 = sshll.u32 %s2656_s18, 4  ;;  %s2365_s25 = int_to_ptr.vmem [resolvable:$false] %s2364_s25 }
  0xf2   : > { %s2366_s30 = scalar_lea.vmem %s2365_s25, 512  ;;  %p2367_p1 = scmp.lt.s32.totalorder %s3086_s3, %s2365_s25 }
  0xf3   : > { %p2362_p3 = pnand %p2360_p9, %p3648_p5  ;;  %p2368_p13 = scmp.lt.s32.totalorder %s2366_s30, %s2359_s8 }
  0xf5   : > { %p2363_p10 = pneg %p2362_p3  ;;  %p2369_p2 = por %p2368_p13, %p2367_p1 }
  0xf7   : > { %p2370_p7 = pnand %p2369_p2, %p2363_p10 }
  0xf9   : > { %2373 = shalt.err (!%p2370_p7)
}
  0xfa   : > { %p3649_p4 = scmp.ne.s32.totalorder %s3628_s29, 0  ;;  %s3650_s20 = smov 8  }
  0xfb   : > { %s3651_s17 = smov 128   ;;  %s3121_s27 = scalar_lea.hbm %s3538_s2, %s2891_s23 }
  0xfc   : > { %1990 = dma.hbm_to_vmem [thread:$0]  (!%p3649_p4), %s3083_s15, 256, %s3086_s3, %s3090_s6, %s3651_s17, %s3651_s17, %s3650_s20  }
  0xfd   : > { %s459_s1 = scalar_lea.vmem [#allocation12], %s2888_s11  ;;  %s2374_s8 = scalar_lea.hbm %s3121_s27, 256 }
  0xfe   : > { %s468_s26 = sshll.u32 %s459_s1, 4  ;;  %p2375_p11 = scmp.ne.s32.totalorder %s3121_s27, %s2374_s8  ;;  %s3124_s26 = int_to_ptr.vmem [resolvable:$true] %s468_s26 }
  0xff   : > { %s2379_s3 = scalar_lea.hbm %s3538_s2, 512  ;;  %p2380_p8 = scmp.lt.u32.totalorder %s3121_s27, %s3538_s2 }
 0x100   : > { %p2377_p12 = pnand %p2375_p11, %p3648_p5  ;;  %p2381_p9 = scmp.lt.u32.totalorder %s2379_s3, %s2374_s8 }
 0x101   : > { %p2383_p10 = scmp.lt.u32.totalorder %s2374_s8, %s3121_s27 }
 0x102   : > { %p2378_p0 = pneg %p2377_p12  ;;  %p2382_p3 = por %p2381_p9, %p2380_p8 }
 0x104   : > { %p2384_p1 = por %p2383_p10, %p2382_p3 }
 0x106   : > { %p2385_p13 = pnand %p2384_p1, %p2378_p0 }
 0x108   : > { %2388 = shalt.err (!%p2385_p13)
}
 0x109   : > { %s2389_s11 = scalar_lea.vmem %s3124_s26, 256  ;;  %s2657_s25 = smov [#allocation12]  }
 0x10a   : > { %p2390_p2 = scmp.ne.s32.totalorder %s3124_s26, %s2389_s11  ;;  %s2394_s30 = sshll.u32 %s2657_s25, 4  ;;  %s2395_s30 = int_to_ptr.vmem [resolvable:$false] %s2394_s30 }
 0x10b   : > { %s2396_s5 = scalar_lea.vmem %s2395_s30, 512  ;;  %p2397_p12 = scmp.lt.s32.totalorder %s3124_s26, %s2395_s30 }
 0x10c   : > { %p2392_p7 = pnand %p2390_p2, %p3648_p5  ;;  %p2398_p6 = scmp.lt.s32.totalorder %s2396_s5, %s2389_s11 }
 0x10e   : > { %p2393_p11 = pneg %p2392_p7  ;;  %p2399_p8 = por %p2398_p6, %p2397_p12 }
 0x110   : > { %p2400_p9 = pnand %p2399_p8, %p2393_p11 }
 0x112   : > { %2403 = shalt.err (!%p2400_p9)
}
 0x113   : > { %s3652_s24 = scalar_lea.sflag [#allocation11], %s2900_s16  ;;  %s3156_s8 = scalar_lea.hbm %s3540_s4, %s2999_s14 }
 0x114   : > { %1996 = dma.hbm_to_vmem [thread:$0]  (!%p3649_p4), %s3121_s27, 256, %s3124_s26, %s3652_s24, %s3651_s17, %s3651_s17, %s3650_s20  }
 0x115   : > { %s503_s29 = scalar_lea.vmem [#allocation15], %s2989_s28  ;;  %s2404_s15 = scalar_lea.hbm %s3156_s8, 1024 }
 0x116   : > { %s510_s18 = sshll.u32 %s503_s29, 4  ;;  %p2405_p6 = scmp.ne.s32.totalorder %s3156_s8, %s2404_s15  ;;  %s3159_s18 = int_to_ptr.vmem [resolvable:$true] %s510_s18 }
 0x117   : > { %p3653_p5 = scmp.ne.s32.totalorder %s3643_s21, 0  ;;  %s2409_s17 = scalar_lea.hbm %s3540_s4, 4096 }
 0x118   : > { %p2410_p4 = scmp.lt.u32.totalorder %s3156_s8, %s3540_s4  ;;  %p2411_p10 = scmp.lt.u32.totalorder %s2409_s17, %s2404_s15 }
 0x119   : > { %p2407_p0 = pnand %p2405_p6, %p3653_p5  ;;  %p2413_p13 = scmp.lt.u32.totalorder %s2404_s15, %s3156_s8 }
 0x11a   : > { %p2412_p1 = por %p2411_p10, %p2410_p4 }
 0x11b   : > { %p2408_p3 = pneg %p2407_p0 }
 0x11c   : > { %p2414_p2 = por %p2413_p13, %p2412_p1 }
 0x11e   : > { %p2415_p7 = pnand %p2414_p2, %p2408_p3 }
 0x120   : > { %2418 = shalt.err (!%p2415_p7)
}
 0x121   : > { %s2419_s6 = scalar_lea.vmem %s3159_s18, 1024  ;;  %s2658_s23 = smov [#allocation15]  }
 0x122   : > { %p2420_p11 = scmp.ne.s32.totalorder %s3159_s18, %s2419_s6  ;;  %s2424_s11 = sshll.u32 %s2658_s23, 4  ;;  %s2425_s11 = int_to_ptr.vmem [resolvable:$false] %s2424_s11 }
 0x123   : > { %s2426_s25 = scalar_lea.vmem %s2425_s11, 2048  ;;  %p2427_p9 = scmp.lt.s32.totalorder %s3159_s18, %s2425_s11 }
 0x124   : > { %p2422_p12 = pnand %p2420_p11, %p3653_p5  ;;  %p2428_p6 = scmp.lt.s32.totalorder %s2426_s25, %s2419_s6 }
 0x126   : > { %p2423_p8 = pneg %p2422_p12  ;;  %p2429_p0 = por %p2428_p6, %p2427_p9 }
 0x128   : > { %p2430_p4 = pnand %p2429_p0, %p2423_p8 }
 0x12a   : > { %2433 = shalt.err (!%p2430_p4)
}
 0x12b   : > { %p3654_p3 = scmp.ne.s32.totalorder %s3637_s12, 0  ;;  %s3655_s30 = scalar_lea.sflag [#allocation14], %s2900_s16 }
 0x12c   : > { %s3656_s9 = sld [smem:[#allocation56_spill]]  ;;  %s545_s29 = scalar_lea.vmem [#allocation18], %s2989_s28 }
 0x12d   : > { %2002 = dma.hbm_to_vmem [thread:$0]  (!%p3654_p3), %s3156_s8, 1024, %s3159_s18, %s3655_s30, %s2653_s13, %s2653_s13, %s2654_s7  }
 0x12e   : > { %s552_s15 = sshll.u32 %s545_s29, 4  ;;  %s3194_s15 = int_to_ptr.vmem [resolvable:$true] %s552_s15 }
 0x132   : > { %s3191_s1 = scalar_lea.hbm %s3656_s9, %s2999_s14  ;;  %s2439_s18 = scalar_lea.hbm %s3656_s9, 4096 }
 0x133   : > { %s2434_s3 = scalar_lea.hbm %s3191_s1, 1024  ;;  %p2440_p2 = scmp.lt.u32.totalorder %s3191_s1, %s3656_s9 }
 0x134   : > { %p2435_p10 = scmp.ne.s32.totalorder %s3191_s1, %s2434_s3  ;;  %p2441_p7 = scmp.lt.u32.totalorder %s2439_s18, %s2434_s3 }
 0x135   : > { %p2443_p12 = scmp.lt.u32.totalorder %s2434_s3, %s3191_s1 }
 0x136   : > { %p2437_p1 = pnand %p2435_p10, %p3653_p5  ;;  %p2442_p11 = por %p2441_p7, %p2440_p2 }
 0x138   : > { %p2438_p13 = pneg %p2437_p1  ;;  %p2444_p8 = por %p2443_p12, %p2442_p11 }
 0x13a   : > { %p2445_p9 = pnand %p2444_p8, %p2438_p13 }
 0x13c   : > { %2448 = shalt.err (!%p2445_p9)
}
 0x13d   : > { %s2449_s28 = scalar_lea.vmem %s3194_s15, 1024  ;;  %s2659_s27 = smov [#allocation18]  }
 0x13e   : > { %p2450_p6 = scmp.ne.s32.totalorder %s3194_s15, %s2449_s28  ;;  %s2454_s26 = sshll.u32 %s2659_s27, 4  ;;  %s2455_s26 = int_to_ptr.vmem [resolvable:$false] %s2454_s26 }
 0x13f   : > { %s2456_s6 = scalar_lea.vmem %s2455_s26, 2048  ;;  %p2457_p10 = scmp.lt.s32.totalorder %s3194_s15, %s2455_s26 }
 0x140   : > { %p2452_p0 = pnand %p2450_p6, %p3653_p5  ;;  %p2458_p1 = scmp.lt.s32.totalorder %s2456_s6, %s2449_s28 }
 0x142   : > { %p2453_p4 = pneg %p2452_p0  ;;  %p2459_p2 = por %p2458_p1, %p2457_p10 }
 0x144   : > { %p2460_p7 = pnand %p2459_p2, %p2453_p4 }
 0x146   : > { %2463 = shalt.err (!%p2460_p7)
}
 0x147   : > { %s3657_s23 = scalar_lea.sflag [#allocation17], %s2900_s16  ;;  %s3658_s11 = sld [smem:[#allocation40_spill]] }
 0x148   : > { %2008 = dma.hbm_to_vmem [thread:$0]  (!%p3654_p3), %s3191_s1, 1024, %s3194_s15, %s3657_s23, %s2653_s13, %s2653_s13, %s2654_s7  }
 0x149   : > { %s3659_s25 = sand.u32 1, %s2612_s19   ;;  %s3660_s3 = sld [smem:[#allocation57_spill]] }
 0x14a   : > { %s1754_s30 = sshll.u32 %s3659_s25, 4  ;;  %s563_s17 = scalar_lea.sflag [#allocation20], %s2900_s16 }
 0x14b   : > { %s566_s8 = scalar_lea.vmem [#allocation19], %s1754_s30 }
 0x14c   : > { %s573_s18 = sshll.u32 %s566_s8, 4  ;;  %s3230_s18 = int_to_ptr.vmem [resolvable:$true] %s573_s18 }
 0x14d   : > { %s1822_s5 = sshll.u32 %s3658_s11, 8 }
 0x14f   : > { %s3228_s20 = scalar_lea.hbm %s3660_s3, %s1822_s5  ;;  %s2469_s28 = scalar_lea.hbm %s3660_s3, 1024 }
 0x150   : > { %s2464_s14 = scalar_lea.hbm %s3228_s20, 256  ;;  %p2470_p8 = scmp.lt.u32.totalorder %s3228_s20, %s3660_s3 }
 0x151   : > { %p2465_p13 = scmp.ne.s32.totalorder %s3228_s20, %s2464_s14  ;;  %p2471_p9 = scmp.lt.u32.totalorder %s2469_s28, %s2464_s14 }
 0x152   : > { %p2473_p0 = scmp.lt.u32.totalorder %s2464_s14, %s3228_s20 }
 0x153   : > { %p2467_p11 = pnand %p2465_p13, %p3653_p5  ;;  %p2472_p6 = por %p2471_p9, %p2470_p8 }
 0x155   : > { %p2468_p12 = pneg %p2467_p11  ;;  %p2474_p4 = por %p2473_p0, %p2472_p6 }
 0x157   : > { %p2475_p10 = pnand %p2474_p4, %p2468_p12 }
 0x159   : > { %2478 = shalt.err (!%p2475_p10)
}
 0x15a   : > { %s2479_s6 = scalar_lea.vmem %s3230_s18, 256  ;;  %s2660_s23 = smov [#allocation19]  }
 0x15b   : > { %p2480_p1 = scmp.ne.s32.totalorder %s3230_s18, %s2479_s6  ;;  %s2484_s11 = sshll.u32 %s2660_s23, 4  ;;  %s2485_s11 = int_to_ptr.vmem [resolvable:$false] %s2484_s11 }
 0x15c   : > { %s2486_s25 = scalar_lea.vmem %s2485_s11, 512  ;;  %p2487_p13 = scmp.lt.s32.totalorder %s3230_s18, %s2485_s11 }
 0x15d   : > { %p2482_p2 = pnand %p2480_p1, %p3653_p5  ;;  %p2488_p11 = scmp.lt.s32.totalorder %s2486_s25, %s2479_s6 }
 0x15f   : > { %p2483_p7 = pneg %p2482_p2  ;;  %p2489_p8 = por %p2488_p11, %p2487_p13 }
 0x161   : > { %p2490_p9 = pnand %p2489_p8, %p2483_p7 }
 0x163   : > { %2493 = shalt.err (!%p2490_p9)
}
 0x164   : > { %2011 = dma.hbm_to_vmem [thread:$0]  (!%p3654_p3), %s3228_s20, 256, %s3230_s18, %s563_s17, %s2653_s13, %s2653_s13, %s2654_s7  }
 0x165   : > { %s3661_s21 = sld [smem:[#allocation47_spill]] }
 0x16b   : > { %p3662_p5 = scmp.ne.s32.totalorder %s3661_s21, 0 }
 0x16c   : > { %s3663_s30 = sld [smem:[#allocation37_spill]] (!%p3662_p5)  ;;  %s3664_s5 = sld [smem:[#allocation44_spill]] (!%p3662_p5) }
 0x16d   : > { %585 = sbr.rel (%p3662_p5) target bundleno = 2287 (0x8ef), region = 64 }
 0x172   : > { %s3262_s24 = sand.u32 (!%p3662_p5), 1, %s3663_s30   ;;  %p3665_p12 = scmp.ne.s32.totalorder (!%p3662_p5), %s3664_s5, 0 }
 0x173   : > { %s3265_s29 = sshll.u32 (!%p3662_p5), %s3262_s24, 4  ;;  %s588_s12 = scalar_lea.sflag (!%p3662_p5), [#allocation8], %s3262_s24 }
 0x174   : > { %s591_s8 = scalar_lea.vmem [#allocation7], %s3265_s29 }
 0x175   : > { %2567 = dma.done.wait (%p3665_p12), %s588_s12, 256  }
 0x176   : > { %2569 = vsyncadd (%p3665_p12), %s588_s12, 4294967040  ;;  %s3666_s16 = sld [smem:[#allocation43_spill]]  ;;  %s600_s20 = scalar_lea.vmem [#allocation10], %s3265_s29 }
 0x17c   : > { %s596_s13 = sand.u32 1, %s3666_s16  }
 0x17d   : > { %s597_s7 = scalar_lea.sflag [#allocation11], %s596_s13 }
 0x17e   : > { %2571 = dma.done.wait (%p3665_p12), %s597_s7, 512  }
 0x17f   : > { %2573 = vsyncadd (%p3665_p12), %s597_s7, 4294966784  ;;  %s609_s18 = scalar_lea.vmem [#allocation12], %s3265_s29  ;;  %s615_s17 = scalar_lea.sflag [#allocation14], %s596_s13 }
 0x180   : > { %s618_s14 = scalar_lea.vmem [#allocation13], %s3265_s29 }
 0x181   : > { %2575 = dma.done.wait (%p3665_p12), %s615_s17, 256  }
 0x182   : > { %2577 = vsyncadd (%p3665_p12), %s615_s17, 4294967040  ;;  %s3667_s1 = sld [smem:[#allocation35_spill]]  ;;  %s3668_s15 = sld [smem:[#allocation45_spill]] }
 0x188   : > { %s625_s28 = sand.u32 1, %s3667_s1   ;;  %p3669_p3 = scmp.ne.s32.totalorder %s3668_s15, 0 }
 0x189   : > { %s1762_s27 = sshll.u32 %s625_s28, 6 }
 0x18a   : > { %s3286_s26 = scalar_lea.vmem [#allocation15], %s1762_s27 }
 0x18b   : > { %2579 = dma.done.wait (%p3669_p3), %s615_s17, 1024  }
 0x18c   : > { %2581 = vsyncadd (%p3669_p3), %s615_s17, 4294966272  ;;  %s633_s6 = scalar_lea.sflag [#allocation17], %s596_s13  ;;  %s3292_s23 = scalar_lea.vmem [#allocation16], %s1762_s27 }
 0x18d   : > { %2583 = dma.done.wait (%p3669_p3), %s633_s6, 2048  }
 0x18e   : > { %2585 = vsyncadd (%p3669_p3), %s633_s6, 4294965248  ;;  %s3298_s11 = sshll.u32 %s625_s28, 4  ;;  %s3300_s25 = scalar_lea.vmem [#allocation18], %s1762_s27 }
 0x18f   : > { %s651_s21 = scalar_lea.sflag [#allocation20], %s596_s13  ;;  %s654_s30 = scalar_lea.vmem [#allocation19], %s3298_s11 }
 0x190   : > { %2587 = dma.done.wait (%p3669_p3), %s651_s21, 256  }
 0x191   : > { %2589 = vsyncadd (%p3669_p3), %s651_s21, 4294967040  ;;  %p3670_p6 = scmp.eq.s32.totalorder %s3666_s16, 0 }
 0x193   : > { %2591 = dma.done.wait (%p3670_p6), [#allocation20], 16   ;;  %p3671_p0 = pmov %p3670_p6 }
 0x195   : > { %2593 = vsyncadd (%p3671_p0), [#allocation20], 4294967280  ;;  %p3672_p4 = pmov %p3671_p0 }
 0x196   : > { %p3673_p10 = pmov %p3671_p0 }
 0x197   : > { %2595 = dma.done.wait (%p3672_p4), [#allocation23], 32  }
 0x198   : > { %2597 = vsyncadd (%p3673_p10), [#allocation23], 4294967264  ;;  %s1769_s5 = sshll.u32 %s3262_s24, 3  ;;  %v2661_v0 = vmov 0.0   ;;  %vm2662_vm0 = vmmov 0   ;;  %v2126_v1 = vld [vmem:[%s3286_s26] sm:$0xff]  }
 0x199   : > { %1867 = vmatprep.subr.bf16.mxu0 %v2661_v0  ;;  %1883 = vmatprep.mubr.msk.bf16.mxu0 %vm2662_vm0, %v2661_v0  ;;  %v2127_v2 = vld [vmem:[%s3286_s26 + $0x8] sm:$0xff]   ;;  %v2128_v3 = vld [vmem:[%s3286_s26 + $0x10] sm:$0xff]   ;;  %v2129_v4 = vld [vmem:[%s3286_s26 + $0x18] sm:$0xff]   ;;  %s3674_s12 = sld [smem:[#allocation38_spill]]  ;;  %vm749_vm1 = vcmask 7168   ;;  %vm756_vm2 = vcmask 261120  }
 0x19a   : > { %1868 = vmatpush3.bf16.msra.mxu0 %v2126_v1  ;;  %v2130_v5 = vld [vmem:[%s3286_s26 + $0x20] sm:$0xff]   ;;  %v2131_v6 = vld [vmem:[%s3286_s26 + $0x28] sm:$0xff]   ;;  %v2132_v7 = vld [vmem:[%s3286_s26 + $0x30] sm:$0xff]   ;;  %v2663_v12 = vmov -inf   ;;  %s3369_s15 = scalar_lea.vmem [#allocation25], %s1769_s5 }
 0x19b   : > { %1869 = vmatprep.subr.bf16.mxu0 %v2661_v0  ;;  %v2133_v8 = vld [vmem:[%s3286_s26 + $0x38] sm:$0xff]   ;;  %v759_v9 = vld [vmem:[%s591_s8] sm:$0xff] }
 0x19c   : > { %v760_v10 = vld [vmem:[%s591_s8 + $0x8] sm:$0xff] }
 0x19d   : > { %v761_v11 = vpack.c.bf16 %v760_v10, %v759_v9 }
 0x19e   : > { %1870 = vmatpush3.bf16.msra.mxu0 %v2127_v2 }
 0x19f   : > { %1871 = vmatprep.subr.bf16.mxu0 %v2661_v0  ;;  %s1770_s16 = sshll.u32 %s3674_s12, 4  ;;  %p871_p1 = scmp.eq.s32.totalorder %s3674_s12, 0 }
 0x1a0   : > { %s3339_s13 = scalar_lea.vmem [#allocation3], %s1770_s16  ;;  %s3345_s8 = scalar_lea.vmem [#allocation4], %s1770_s16  ;;  %v2664_v18 = vmov (%p871_p1), 0.0  }
 0x1a1   : > { %750 = vst.msk [vmem:[%s3339_s13] sm:$0xff] %vm749_vm1, %v2663_v12  ;;  %751 = vst.msk [vmem:[%s3339_s13 + $0x8] sm:$0xff] %vm749_vm1, %v2663_v12  ;;  %s3353_s7 = scalar_lea.vmem [#allocation5], %s1770_s16  ;;  %s1779_s17 = sshll.u32 %s3674_s12, 3 }
 0x1a2   : > { %1872 = vmatpush3.bf16.msra.mxu0 %v2128_v3  ;;  %753 = vst.msk [vmem:[%s3345_s8] sm:$0xff] %vm749_vm1, %v2661_v0  ;;  %754 = vst.msk [vmem:[%s3345_s8 + $0x8] sm:$0xff] %vm749_vm1, %v2661_v0  ;;  %s3363_s1 = scalar_lea.vmem [#allocation2], %s1779_s17 }
 0x1a3   : > { %1873 = vmatprep.subr.bf16.mxu0 %v2661_v0  ;;  %757 = vst.msk [vmem:[%s3353_s7] sm:$0xff] %vm756_vm2, %v2661_v0  ;;  %758 = vst.msk [vmem:[%s3353_s7 + $0x8] sm:$0xff] %vm756_vm2, %v2661_v0 }
 0x1a4   : > { %876 = vst [vmem:[#allocation6] sm:$0xff] (%p871_p1), %v2664_v18  ;;  %877 = vst [vmem:[#allocation6 + $0x8] sm:$0xff] (%p871_p1), %v2664_v18 }
 0x1a6   : > { %1874 = vmatpush3.bf16.msra.mxu0 %v2129_v4 }
 0x1a7   : > { %1875 = vmatprep.subr.bf16.mxu0 %v2661_v0 }
 0x1aa   : > { %1876 = vmatpush3.bf16.msra.mxu0 %v2130_v5 }
 0x1ab   : > { %1877 = vmatprep.subr.bf16.mxu0 %v2661_v0 }
 0x1ae   : > { %1878 = vmatpush3.bf16.msra.mxu0 %v2131_v6 }
 0x1af   : > { %1879 = vmatprep.subr.bf16.mxu0 %v2661_v0 }
 0x1b2   : > { %1880 = vmatpush3.bf16.msra.mxu0 %v2132_v7 }
 0x1b3   : > { %1881 = vmatprep.subr.bf16.mxu0 %v2661_v0 }
 0x1b6   : > { %1882 = vmatpush3.bf16.msra.mxu0 %v2133_v8 }
 0x1b9   : > { %1884 = vmatmul.mubr.bf16.vlgmr.msra.gmra.mrb[0].mxu0 %v761_v11 }
 0x28b   : > { %875 = sbr.rel (!%p871_p1) target bundleno = 658 (0x292), region = 116 }
 0x28c   : > { %v860_v13 = vpop.f32.mrb[0].mxu0 }
 0x28d   : > { %v1885_v14 = vpop.f32.mrb[1].mxu0 }
 0x28e   : > { %v863_v15 = vpop.f32.mrb[2].mxu0 }
 0x28f   : > { %v867_v16 = vpack.c.bf16 %v863_v15, %v860_v13  ;;  %v1886_v17 = vpop.f32.mrb[3].mxu0 }
 0x291   : > { %870 = vst.msk [vmem:[%s3363_s1] sm:$0xff] %vm756_vm2, %v867_v16 }
 0x292 PF: > { %1887 = vmatprep.subr.bf16.mxu1 %v2661_v0  ;;  %v2136_v19 = vld [vmem:[%s3292_s23] sm:$0xff]   ;;  %1903 = vmatprep.mubr.msk.bf16.mxu1 %vm2662_vm0, %v2661_v0  ;;  %v2137_v20 = vld [vmem:[%s3292_s23 + $0x8] sm:$0xff]   ;;  %v2138_v21 = vld [vmem:[%s3292_s23 + $0x10] sm:$0xff]   ;;  %vm1150_vm3 = vcmask 130048   ;;  %v2665_v54 = vmov 0  }
 0x293   : > { %1907 = vmatprep.subr.bf16.mxu0 %v2661_v0  ;;  %1923 = vmatprep.mubr.msk.bf16.mxu0 %vm2662_vm0, %v2661_v0  ;;  %v2139_v22 = vld [vmem:[%s3292_s23 + $0x18] sm:$0xff]   ;;  %v2140_v23 = vld [vmem:[%s3292_s23 + $0x20] sm:$0xff]   ;;  %v2141_v24 = vld [vmem:[%s3292_s23 + $0x28] sm:$0xff]  }
 0x294   : > { %1888 = vmatpush3.bf16.msra.mxu1 %v2136_v19  ;;  %v2142_v25 = vld [vmem:[%s3292_s23 + $0x30] sm:$0xff]   ;;  %v2143_v26 = vld [vmem:[%s3292_s23 + $0x38] sm:$0xff]   ;;  %v2144_v37 = vld [vmem:[%s3300_s25] sm:$0xff]   ;;  %2134 = vset.pattern.permute.xlu1 %v2665_v54 }
 0x295   : > { %1889 = vmatprep.subr.bf16.mxu1 %v2661_v0  ;;  %v878_v27 = vld [vmem:[%s600_s20] sm:$0xff]  ;;  %v879_v28 = vld [vmem:[%s600_s20 + $0x8] sm:$0xff]  ;;  %1908 = vmatpush3.bf16.msra.mxu0 %v2144_v37  ;;  %s3675_s20 = sld [smem:[#allocation38_spill]] }
 0x296   : > { %v880_v29 = vpack.c.bf16 %v879_v28, %v878_v27  ;;  %v2145_v38 = vld [vmem:[%s3300_s25 + $0x8] sm:$0xff]   ;;  %1909 = vmatprep.subr.bf16.mxu0 %v2661_v0  ;;  %v2146_v39 = vld [vmem:[%s3300_s25 + $0x10] sm:$0xff]   ;;  %v2147_v40 = vld [vmem:[%s3300_s25 + $0x18] sm:$0xff]   ;;  %2135 = vset.pattern.permute.xlu0 %v2665_v54 }
 0x297   : > { %v2148_v41 = vld [vmem:[%s3300_s25 + $0x20] sm:$0xff]   ;;  %v2149_v42 = vld [vmem:[%s3300_s25 + $0x28] sm:$0xff]   ;;  %v2150_v43 = vld [vmem:[%s3300_s25 + $0x30] sm:$0xff]  }
 0x298   : > { %1890 = vmatpush3.bf16.msra.mxu1 %v2137_v20  ;;  %v1096_v36 = vld [vmem:[%s3363_s1] sm:$0xff]  ;;  %v2151_v44 = vld [vmem:[%s3300_s25 + $0x38] sm:$0xff]  }
 0x299   : > { %1891 = vmatprep.subr.bf16.mxu1 %v2661_v0  ;;  %1910 = vmatpush3.bf16.msra.mxu0 %v2145_v38  ;;  %v986_v45 = vld [vmem:[%s609_s18] sm:$0xff]  ;;  %v987_v46 = vld [vmem:[%s609_s18 + $0x8] sm:$0xff] }
 0x29a   : > { %1911 = vmatprep.subr.bf16.mxu0 %v2661_v0  ;;  %v988_v47 = vpack.c.bf16 %v987_v46, %v986_v45  ;;  %v1148_v55 = vld [vmem:[%s3339_s13] sm:$0xff]  ;;  %v1149_v58 = vld [vmem:[%s3339_s13 + $0x8] sm:$0xff] }
 0x29b   : > { %v1182_v20 = vld [vmem:[%s3345_s8] sm:$0xff]  ;;  %p1352_p2 = scmp.eq.s32.totalorder %s3675_s20, 3  ;;  %v1286_v54 = vld [vmem:[#allocation6 + $0x8] sm:$0xff] }
 0x29c   : > { %1892 = vmatpush3.bf16.msra.mxu1 %v2138_v21 }
 0x29d   : > { %1893 = vmatprep.subr.bf16.mxu1 %v2661_v0  ;;  %1912 = vmatpush3.bf16.msra.mxu0 %v2146_v39 }
 0x29e   : > { %1913 = vmatprep.subr.bf16.mxu0 %v2661_v0 }
 0x2a0   : > { %1894 = vmatpush3.bf16.msra.mxu1 %v2139_v22 }
 0x2a1   : > { %1895 = vmatprep.subr.bf16.mxu1 %v2661_v0  ;;  %1914 = vmatpush3.bf16.msra.mxu0 %v2147_v40 }
 0x2a2   : > { %1915 = vmatprep.subr.bf16.mxu0 %v2661_v0 }
 0x2a4   : > { %1896 = vmatpush3.bf16.msra.mxu1 %v2140_v23  ;;  %v1183_v23 = vld [vmem:[%s3345_s8 + $0x8] sm:$0xff] }
 0x2a5   : > { %1897 = vmatprep.subr.bf16.mxu1 %v2661_v0  ;;  %1916 = vmatpush3.bf16.msra.mxu0 %v2148_v41 }
 0x2a6   : > { %1917 = vmatprep.subr.bf16.mxu0 %v2661_v0 }
 0x2a8   : > { %1898 = vmatpush3.bf16.msra.mxu1 %v2141_v24 }
 0x2a9   : > { %1899 = vmatprep.subr.bf16.mxu1 %v2661_v0  ;;  %1918 = vmatpush3.bf16.msra.mxu0 %v2149_v42 }
 0x2aa   : > { %1919 = vmatprep.subr.bf16.mxu0 %v2661_v0 }
 0x2ac   : > { %1900 = vmatpush3.bf16.msra.mxu1 %v2142_v25 }
 0x2ad   : > { %1901 = vmatprep.subr.bf16.mxu1 %v2661_v0  ;;  %1920 = vmatpush3.bf16.msra.mxu0 %v2150_v43 }
 0x2ae   : > { %1921 = vmatprep.subr.bf16.mxu0 %v2661_v0 }
 0x2b0   : > { %1902 = vmatpush3.bf16.msra.mxu1 %v2143_v26 }
 0x2b1   : > { %1927 = vmatprep.subr.bf16.mxu1 %v2661_v0  ;;  %1922 = vmatpush3.bf16.msra.mxu0 %v2151_v44 }
 0x2b3   : > { %1904 = vmatmul.mubr.bf16.vlgmr.msra.gmra.mrb[0].mxu1 %v880_v29 }
 0x2b4   : > { %1929 = vmatprep.mubr.msk.bf16.mxu1 %vm2662_vm0, %v2661_v0  ;;  %1924 = vmatmul.mubr.bf16.vlgmr.msra.gmra.mrb[4].mxu0 %v988_v47 }
 0x386   : > { %v979_v30 = vpop.f32.mrb[0].mxu1 }
 0x387   : > { %v1905_v31 = vpop.f32.mrb[1].mxu1  ;;  %v1087_v63 = vpop.f32.mrb[4].mxu0 }
 0x388   : > { %v982_v32 = vpop.f32.mrb[2].mxu1  ;;  %v1925_v1 = vpop.f32.mrb[5].mxu0  ;;  %v2152_v31 = vld [vmem:[%s654_s30] sm:$0xff]  }
 0x389   : > { %v1097_v33 = vpack.c.bf16 %v982_v32, %v979_v30  ;;  %v1906_v34 = vpop.f32.mrb[3].mxu1  ;;  %v1090_v2 = vpop.f32.mrb[6].mxu0 }
 0x38a   : > { %v1213_v3 = vpack.c.bf16 %v1090_v2, %v1087_v63  ;;  %v1926_v4 = vpop.f32.mrb[7].mxu0  ;;  %v1198_v34 = vld [vmem:[%s3353_s7] sm:$0xff] }
 0x38b   : > { %v1103_v35 = vsel %vm756_vm2, %v1097_v33, 0  ;;  %v2153_v33 = vld [vmem:[%s654_s30 + $0x8] sm:$0xff]  }
 0x38c   : > { %1928 = vmatpush3.bf16.xpose.msra.mxu1 %v1103_v35 }
 0x38d   : > { %1933 = vmatprep.subr.bf16.mxu1 %v2661_v0 }
 0x393   : > { %1930 = vmatmul.mubr.msk.bf16.vlgmr.msra.gmra.mrb[4].mxu1 %vm756_vm2, %v1096_v36  ;;  %v1199_v36 = vld [vmem:[%s3353_s7 + $0x8] sm:$0xff] }
 0x394   : > { %1935 = vmatprep.mubr.msk.bf16.mxu1 %vm2662_vm0, %v2661_v0  ;;  %1934 = vmatpush3.bf16.msra.mxu1 %v1213_v3  ;;  %v1369_v3 = vld [vmem:[%s618_s14 + $0x8] sm:$0xff] (%p1352_p2) }
 0x395   : > { %1939 = vmatprep.subr.bf16.mxu1 %v2661_v0 }
 0x466   : > { %v1139_v48 = vpop.f32.mrb[4].mxu1 }
 0x467   : > { %v1931_v49 = vpop.f32.mrb[5].mxu1  ;;  %v1151_v50 = vsel %vm1150_vm3, %v1139_v48, -inf }
 0x468   : > { %1152 = vmax.xlane.f32.xlu0 %v1151_v50  ;;  %v1142_v51 = vpop.f32.mrb[6].mxu1 }
 0x469   : > { %v1932_v52 = vpop.f32.mrb[7].mxu1  ;;  %v1154_v53 = vsel %vm1150_vm3, %v1142_v51, -inf }
 0x46a   : > { %v1285_v52 = vld [vmem:[#allocation6] sm:$0xff] }
 0x46c   : > { %1155 = vmax.xlane.f32.xlu0 %v1154_v53 }
 0x4f5   : > { %v1153_v56 = vpop.xlane.xlu0 %1152 }
 0x4f6   : > { %v1157_v57 = vmax.f32 %v1148_v55, %v1153_v56 }
 0x4f8   : > { %v1159_v59 = vsub.f32 %v1148_v55, %v1157_v57  ;;  %1262 = vst.msk [vmem:[%s3339_s13] sm:$0xff] %vm749_vm1, %v1157_v57  ;;  %1167 = vperm.xlu1 %2134, %v1157_v57  }
 0x4f9   : > { %v1156_v60 = vpop.xlane.xlu0 %1155 }
 0x4fa   : > { %v1158_v61 = vmax.f32 %v1149_v58, %v1156_v60  ;;  %v1161_v17 = vmul.f32 1.442695, %v1159_v59 }
 0x4fc   : > { %v1160_v62 = vsub.f32 %v1149_v58, %v1158_v61  ;;  %1263 = vst.msk [vmem:[%s3339_s13 + $0x8] sm:$0xff] %vm749_vm1, %v1158_v61  ;;  %1172 = vperm.xlu1 %2134, %v1158_v61   ;;  %v1805_v61 = vld [vmem:[#allocation21] ss:$0 sm:$0xff] (%p1352_p2) }
 0x4fe   : > { %v1163_v16 = vmul.f32 1.442695, %v1160_v62  ;;  %v1368_v62 = vld [vmem:[%s618_s14] sm:$0xff] (%p1352_p2) }
 0x577   : > { %v1168_v5 = vpop.permute.xlu1 %1167 }
 0x578   : > { %v1175_v6 = vsub.f32 %v1139_v48, %v1168_v5 }
 0x57a   : > { %v1177_v7 = vmul.f32 1.442695, %v1175_v6 }
 0x57b   : > { %v1173_v8 = vpop.permute.xlu1 %1172 }
 0x57c   : > { %2154 = vpow2.f32 %v1177_v7  ;;  %v1176_v9 = vsub.f32 %v1142_v51, %v1173_v8 }
 0x57e   : > { %v1179_v10 = vmul.f32 1.442695, %v1176_v9 }
 0x580   : > { %2156 = vpow2.f32 %v1179_v10 }
 0x581   : > { %2158 = vpow2.f32 %v1163_v16 }
 0x582   : > { %2160 = vpow2.f32 %v1161_v17 }
 0x586   : > { %v2155_v11 = vpop.eup %2154 }
 0x587   : > { %v1186_v12 = vsel %vm1150_vm3, %v2155_v11, 0.0 }
 0x588   : > { %1187 = vadd.xlane.f32.xlu0 %v1186_v12 }
 0x58a   : > { %v2157_v13 = vpop.eup %2156 }
 0x58b   : > { %v1189_v14 = vsel %vm1150_vm3, %v2157_v13, 0.0  ;;  %v1212_v15 = vpack.c.bf16 %v2157_v13, %v2155_v11  ;;  %v2159_v18 = vpop.eup %2158 }
 0x58c   : > { %1190 = vadd.xlane.f32.xlu1 %v1189_v14  ;;  %v2161_v19 = vpop.eup %2160  ;;  %v1185_v25 = vmul.f32 %v2159_v18, %v1183_v23 }
 0x58d   : > { %1936 = vmatmul.mubr.msk.bf16.vlgmr.msra.gmra.mrb[8].mxu1 %vm1150_vm3, %v1212_v15  ;;  %v1184_v21 = vmul.f32 %v2161_v19, %v1182_v20 }
 0x58e   : > { %1943 = vmatprep.mubr.msk.bf16.mxu1 %vm2662_vm0, %v2661_v0  ;;  %1940 = vmatpush3.bf16.msra.mxu1 %v2152_v31 }
 0x58f   : > { %1941 = vmatprep.subr.bf16.mxu1 %v2661_v0 }
 0x592   : > { %1942 = vmatpush3.bf16.msra.mxu1 %v2153_v33 }
 0x59d   : > { %1207 = vperm.xlu1 %2134, %v2159_v18  }
 0x59e   : > { %1202 = vperm.xlu0 %2135, %v2161_v19  }
 0x615   : > { %v1188_v22 = vpop.xlane.xlu0 %1187 }
 0x616   : > { %v1192_v24 = vadd.f32 %v1188_v22, %v1184_v21  ;;  %v1806_v22 = vld [vmem:[#allocation22] ss:$0 sm:$0xff] (%p1352_p2) }
 0x618   : > { %1195 = vst.msk [vmem:[%s3345_s8] sm:$0xff] %vm749_vm1, %v1192_v24 }
 0x619   : > { %v1191_v26 = vpop.xlane.xlu1 %1190 }
 0x61a   : > { %v1193_v27 = vadd.f32 %v1191_v26, %v1185_v25  ;;  %v1807_v26 = vld [vmem:[#allocation24] ss:$0 sm:$0xff] (%p1352_p2) }
 0x61c   : > { %1196 = vst.msk [vmem:[%s3345_s8 + $0x8] sm:$0xff] %vm749_vm1, %v1193_v27 }
 0x61d   : > { %v1203_v35 = vpop.permute.xlu0 %1202  ;;  %v1208_v37 = vpop.permute.xlu1 %1207 }
 0x61e   : > { %v1210_v38 = vmul.f32 %v1203_v35, %v1198_v34  ;;  %v1211_v40 = vmul.f32 %v1208_v37, %v1199_v36 }
 0x61f   : > { %v1269_v28 = vld [vmem:[%s3345_s8] sm:$0xff] }
 0x620   : > { %2162 = vrcp.f32 %v1269_v28 }
 0x623   : > { %v1270_v29 = vld [vmem:[%s3345_s8 + $0x8] sm:$0xff] }
 0x624   : > { %2164 = vrcp.f32 %v1270_v29 }
 0x62a   : > { %v2163_v30 = vpop.eup %2162 }
 0x62b   : > { %1275 = vperm.xlu0 %2135, %v2163_v30  }
 0x62e   : > { %v2165_v32 = vpop.eup %2164 }
 0x62f   : > { %1280 = vperm.xlu0 %2135, %v2165_v32  }
 0x660   : > { %v1251_v39 = vpop.f32.mrb[8].mxu1 }
 0x661   : > { %v1258_v41 = vadd.f32 %v1251_v39, %v1210_v38  ;;  %v1937_v42 = vpop.f32.mrb[9].mxu1 }
 0x662   : > { %v1254_v43 = vpop.f32.mrb[10].mxu1 }
 0x663   : > { %1260 = vst.msk [vmem:[%s3353_s7] sm:$0xff] %vm756_vm2, %v1258_v41  ;;  %v1259_v0 = vadd.f32 %v1254_v43, %v1211_v40  ;;  %v1938_v44 = vpop.f32.mrb[11].mxu1 }
 0x665   : > { %1261 = vst.msk [vmem:[%s3353_s7 + $0x8] sm:$0xff] %vm756_vm2, %v1259_v0 }
 0x66a   : > { %v1267_v46 = vld [vmem:[%s3353_s7] sm:$0xff] }
 0x66c   : > { %v1268_v48 = vld [vmem:[%s3353_s7 + $0x8] sm:$0xff] }
 0x6aa   : > { %v1276_v45 = vpop.permute.xlu0 %1275 }
 0x6ab   : > { %v1283_v49 = vmul.f32 %v1276_v45, %v1267_v46 }
 0x6ae   : > { %v1281_v47 = vpop.permute.xlu0 %1280 }
 0x6af   : > { %v1284_v50 = vmul.f32 %v1281_v47, %v1268_v48 }
 0x6b1   : > { %v1287_v51 = vpack.c.bf16 %v1284_v50, %v1283_v49 }
 0x6b3   : > { %1944 = vmatmul.mubr.msk.bf16.vlgmr.msra.gmra.mrb[12].mxu1 %vm756_vm2, %v1287_v51 }
 0x785   : > { %1356 = sbr.rel (!%p1352_p2) target bundleno = 2259 (0x8d3), region = 124 }
 0x786   : > { %v1341_v53 = vpop.f32.mrb[12].mxu1 }
 0x787   : > { %v1348_v55 = vadd.f32 %v1341_v53, %v1285_v52  ;;  %v1945_v56 = vpop.f32.mrb[13].mxu1 }
 0x788   : > { %v1344_v57 = vpop.f32.mrb[14].mxu1 }
 0x789   : > { %1350 = vst [vmem:[#allocation6] sm:$0xff] %v1348_v55  ;;  %v1349_v58 = vadd.f32 %v1344_v57, %v1286_v54  ;;  %v1946_v59 = vpop.f32.mrb[15].mxu1 }
 0x78b   : > { %1351 = vst [vmem:[#allocation6 + $0x8] sm:$0xff] %v1349_v58 }
 0x790   : > { %v1357_v60 = vld [vmem:[#allocation6] sm:$0xff] }
 0x791   : > { %v1366_v63 = vadd.f32 %v1805_v61, %v1357_v60 }
 0x792   : > { %v1358_v1 = vld [vmem:[#allocation6 + $0x8] sm:$0xff] }
 0x793   : > { %v1367_v2 = vadd.f32 %v1805_v61, %v1358_v1  ;;  %v1370_v4 = vadd.f32 %v1368_v62, %v1366_v63 }
 0x795   : > { %1372 = vadd.xlane.f32.xlu0 %v1370_v4  ;;  %v1371_v5 = vadd.f32 %v1369_v3, %v1367_v2 }
 0x799   : > { %1374 = vadd.xlane.f32.xlu0 %v1371_v5 }
 0x822   : > { %v1373_v6 = vpop.xlane.xlu0 %1372 }
 0x823   : > { %v1377_v7 = vmul.f32 0.0078125, %v1373_v6 }
 0x825   : > { %v1379_v8 = vsub.f32 %v1370_v4, %v1377_v7 }
 0x826   : > { %v1375_v9 = vpop.xlane.xlu0 %1374 }
 0x827   : > { %v1378_v10 = vmul.f32 0.0078125, %v1375_v9  ;;  %v1381_v11 = vmul.f32 %v1379_v8, %v1379_v8 }
 0x829   : > { %v1380_v12 = vsub.f32 %v1371_v5, %v1378_v10  ;;  %1383 = vadd.xlane.f32.xlu1 %v1381_v11 }
 0x82b   : > { %v1382_v13 = vmul.f32 %v1380_v12, %v1380_v12 }
 0x82d   : > { %1385 = vadd.xlane.f32.xlu1 %v1382_v13 }
 0x8b6   : > { %v1384_v14 = vpop.xlane.xlu1 %1383 }
 0x8b7   : > { %v1387_v15 = vmul.f32 0.0078125, %v1384_v14 }
 0x8b9   : > { %v1389_v16 = vadd.f32 1e-05, %v1387_v15 }
 0x8ba   : > { %v1386_v17 = vpop.xlane.xlu1 %1385 }
 0x8bb   : > { %2166 = vrsqrt.f32 %v1389_v16  ;;  %v1388_v18 = vmul.f32 0.0078125, %v1386_v17 }
 0x8bd   : > { %v1390_v19 = vadd.f32 1e-05, %v1388_v18 }
 0x8bf   : > { %2168 = vrsqrt.f32 %v1390_v19 }
 0x8c5   : > { %v2167_v20 = vpop.eup %2166 }
 0x8c6   : > { %v1393_v21 = vmul.f32 %v2167_v20, %v1379_v8 }
 0x8c8   : > { %v1402_v24 = vmul.f32 %v1806_v22, %v1393_v21 }
 0x8c9   : > { %v2169_v23 = vpop.eup %2168 }
 0x8ca   : > { %v1394_v25 = vmul.f32 %v2169_v23, %v1380_v12  ;;  %v1411_v28 = vadd.f32 %v1807_v26, %v1402_v24 }
 0x8cc   : > { %v1403_v27 = vmul.f32 %v1806_v22, %v1394_v25 }
 0x8ce   : > { %v1412_v29 = vadd.f32 %v1807_v26, %v1403_v27 }
 0x8d0   : > { %v1831_v30 = vpack.c.bf16 %v1412_v29, %v1411_v28 }
 0x8d2   : > { %1832 = vst [vmem:[%s3369_s15] sm:$0xff] %v1831_v30  }
 0x8d3 PF: > { %s3676_s29 = sld [smem:[#allocation39_spill]]  ;;  %s3677_s18 = sld [smem:[#allocation48_spill]] }
 0x8d4   : > { %s3678_s26 = sld [smem:[#allocation60_spill]]  ;;  %s1437_s11 = sshll.u32 %s3369_s15, 4  ;;  %s3473_s11 = int_to_ptr.vmem [resolvable:$true] %s1437_s11 }
 0x8d5   : > { %s1424_s25 = scalar_lea.sflag [#allocation9], %s3262_s24  ;;  %s2494_s21 = scalar_lea.vmem %s3473_s11, 128 }
 0x8d6   : > { %p2495_p7 = scmp.ne.s32.totalorder %s3473_s11, %s2494_s21  ;;  %s2666_s30 = smov [#allocation25]  }
 0x8d7   : > { %s2498_s5 = sshll.u32 %s2666_s30, 4  ;;  %s2499_s5 = int_to_ptr.vmem [resolvable:$false] %s2498_s5 }
 0x8d8   : > { %s2500_s12 = scalar_lea.vmem %s2499_s5, 256  ;;  %p2501_p9 = scmp.lt.s32.totalorder %s3473_s11, %s2499_s5 }
 0x8d9   : > { %s1827_s14 = sshll.u32 %s3676_s29, 7  ;;  %p3680_p13 = scmp.ne.s32.totalorder %s3677_s18, 0 }
 0x8da   : > { %s3679_s6 = smov %s3678_s26  ;;  %s3470_s23 = scalar_lea.hbm %s3678_s26, %s1827_s14 }
 0x8db   : > { %p2496_p11 = pnand %p2495_p7, %p3680_p13  ;;  %p2502_p5 = scmp.lt.s32.totalorder %s2500_s12, %s2494_s21 }
 0x8dd   : > { %p2497_p8 = pneg %p2496_p11  ;;  %p2503_p12 = por %p2502_p5, %p2501_p9 }
 0x8df   : > { %p2504_p3 = pnand %p2503_p12, %p2497_p8 }
 0x8e1   : > { %2507 = shalt.err (!%p2504_p3)
}
 0x8e2   : > { %s2508_s16 = scalar_lea.hbm %s3470_s23, 128  ;;  %s2512_s7 = scalar_lea.hbm %s3679_s6, 256 }
 0x8e3   : > { %p2509_p6 = scmp.ne.s32.totalorder %s3470_s23, %s2508_s16  ;;  %p2513_p10 = scmp.lt.u32.totalorder %s3470_s23, %s3679_s6 }
 0x8e4   : > { %p2514_p1 = scmp.lt.u32.totalorder %s2512_s7, %s2508_s16  ;;  %p2516_p7 = scmp.lt.u32.totalorder %s2508_s16, %s3470_s23 }
 0x8e5   : > { %p2510_p0 = pnand %p2509_p6, %p3680_p13 }
 0x8e6   : > { %p2515_p2 = por %p2514_p1, %p2513_p10 }
 0x8e7   : > { %p2511_p4 = pneg %p2510_p0 }
 0x8e8   : > { %p2517_p11 = por %p2516_p7, %p2515_p2 }
 0x8ea   : > { %p2518_p8 = pnand %p2517_p11, %p2511_p4 }
 0x8ec   : > { %2521 = shalt.err (!%p2518_p8)
}
 0x8ed   : > { %s2667_s15 = smov 64   ;;  %s2668_s20 = smov 4  }
 0x8ee   : > { %1975 = dma.vmem_to_hbm [thread:$0]  (%p3680_p13), %s3473_s11, 128, %s3470_s23, %s1424_s25, %s2667_s15, %s2667_s15, %s2668_s20  }
 0x8ef PF: > { %s3681_s29 = sld [smem:[#allocation42_spill]]  ;;  %s3682_s14 = sld [smem:[#allocation36_spill]] }
 0x8f0   : > { %s3683_s28 = sld [smem:[#allocation46_spill]] }
 0x8f5   : > { %p2023_p9 = scmp.ge.s32.totalorder %s3681_s29, 2  ;;  %s1452_s27 = sand.u32 1, %s3682_s14  }
 0x8f6   : > { %p3684_p5 = scmp.ne.s32.totalorder %s3683_s28, 0  ;;  %s1453_s26 = scalar_lea.sflag [#allocation9], %s1452_s27 }
 0x8f8   : > { %p2013_p12 = pnand %p2023_p9, %p3684_p5 }
 0x8fa   : > { %2599 = dma.done.wait (!%p2013_p12), %s1453_s26, 128  }
 0x8fb   : > { %2601 = vsyncadd (!%p2013_p12), %s1453_s26, 4294967168  ;;  %s40_s27 = sadd.s32 1, %s3681_s29   ;;  %s3685_s17 = sld [smem:[#allocation35_spill]] }
 0x8fc   : > { %p37_p3 = scmp.ge.s32.totalorder %s40_s27, 10   ;;  %s3686_s21 = sld [smem:[#allocation51_spill]] }
 0x8fd   : > { %s3687_s20 = sld [smem:[#allocation37_spill]]  ;;  %s3688_s24 = sld [smem:[#allocation52_spill]] }
 0x8fe   : > { %s3689_s23 = sld [smem:[#allocation40_spill]]  ;;  %s3690_s11 = sld [smem:[#allocation41_spill]] }
 0x8ff   : > { %s3691_s25 = sld [smem:[#allocation49_spill]]  ;;  %s3692_s26 = sld [smem:[#allocation50_spill]] }
 0x900   : > { %s3693_s18 = smov %s2612_s19  ;;  %39 = sbr.rel (!%p37_p3) target bundleno = 27 (0x1b), region = 230 }
 0x902   : > { %s3694_s19 = smov %s3686_s21  ;;  %s3695_s21 = smov %s2624_s22 }
 0x903   : > { %s3696_s22 = smov %s3688_s24 }
 0x904   : > { %s3697_s24 = smov %s3690_s11 }
 0x907   :  { %1458 = vsyncpa [#allocation8], 1 }
 0x908   :  { %1460 = vsyncpa [#allocation8 + $0x1], 1 }
 0x909   :  { %1461 = vsyncpa [#allocation11], 1 }
 0x90a   :  { %1463 = vsyncpa [#allocation11 + $0x1], 1 }
 0x90b   :  { %1464 = vsyncpa [#allocation14], 1 }
 0x90c   :  { %1466 = vsyncpa [#allocation14 + $0x1], 1 }
 0x90d   :  { %1467 = vsyncpa [#allocation17], 1 }
 0x90e   :  { %1469 = vsyncpa [#allocation17 + $0x1], 1 }
 0x90f   :  { %1470 = vsyncpa [#allocation20], 1 }
 0x910   :  { %1472 = vsyncpa [#allocation20 + $0x1], 1 }
 0x911   :  { %1473 = vsyncpa [#allocation23], 1 }
 0x912   :  { %1474 = vsyncpa [#allocation9], 1 }
 0x913   :  { %1476 = vsyncpa [#allocation9 + $0x1], 1 }

</bundles_post_ra>
